<compile_context>
chip_gen: v5e
topology: v5e:2x2
jax: 0.10.0
libtpu: 0.0.40
codegen_flags: <defaults>
</compile_context>

<pallas_src>
import jax
import jax.numpy as jnp
from jax.experimental import pallas as pl
from jax.experimental.pallas import tpu as pltpu


H1, H2 = 20, 10  # SAE hidden widths (fc1/fc3 -> 20, fc2 -> 10)


def _round_up(n, m):
    return ((n + m - 1) // m) * m


def sae_kernel(x_ref,
               w1_ref, b1_ref,
               w2_ref, b2_ref,
               w3_ref, b3_ref,
               w4_ref, b4_ref,
               o_ref):
    """One batch tile of the SAE forward pass.

    x_ref : (TB, M) f32   -- batch on sublanes, movies on lanes (unpadded)
    w1_ref: (M, 20) bf16  -- fc1 weight pre-transposed (in, out): plain MXU dot
    w2_ref: (20, 10) bf16, w3_ref: (10, 20) bf16
    w4_ref: (20, M) bf16  -- fc4 weight transposed (in, out), lane dense
    biases: (1, out) f32
    o_ref : (TB, M) bf16
    """
    # Cast in VMEM: avoids a separate XLA pad/convert pass over x in HBM.
    x = x_ref[...].astype(jnp.bfloat16)
    # fc1: (TB, M) @ (M, 20), bf16 MXU inputs, f32 accumulation.
    h = jax.nn.sigmoid(
        jnp.dot(x, w1_ref[...], preferred_element_type=jnp.float32)
        + b1_ref[...])
    # Tiny fc2/fc3: one MXU pass each; EUP sigmoids hide under the MXU/DMA path.
    h = jax.nn.sigmoid(
        jnp.dot(h.astype(jnp.bfloat16), w2_ref[...],
                preferred_element_type=jnp.float32) + b2_ref[...])
    h = jax.nn.sigmoid(
        jnp.dot(h.astype(jnp.bfloat16), w3_ref[...],
                preferred_element_type=jnp.float32) + b3_ref[...])
    # fc4: (TB, 20) @ (20, M); b4 added in f32, then downcast for the store.
    y = jnp.dot(h.astype(jnp.bfloat16), w4_ref[...],
                preferred_element_type=jnp.float32) + b4_ref[...]
    o_ref[...] = y.astype(o_ref.dtype)


def _physical_vmem_bytes():
    try:
        return int(pltpu.get_tpu_info().vmem_capacity_bytes)
    except Exception:
        return 64 * 1024 * 1024  # conservative: v7x per-TensorCore VMEM


def sae_forward(x, params, *, tb=None, out_dtype=jnp.bfloat16):
    """x: (B, nbMovies) f32.  Returns (B, nbMovies) `out_dtype` (bf16 default)."""
    B, M = x.shape

    # Batch tile: 256 fills the 256x256 MXU M-dim on v6e/v7x, but only when the
    # batch still gives >= 2 tiles per TensorCore (v7x has 2 TCs); small
    # batches stay at 128 so both v7x cores still get a tile each.
    if tb is None:
        tb = 256 if B >= 4 * 256 else 128
    tb = min(tb, _round_up(B, 8))
    n_tiles = pl.cdiv(B, tb)
    Bp = n_tiles * tb

    # Weights are tiny and constant: cast to bf16 once in the wrapper.
    w1 = params["w1t"].astype(jnp.bfloat16)   # (M, 20)
    w2 = params["w2t"].astype(jnp.bfloat16)   # (20, 10)
    w3 = params["w3t"].astype(jnp.bfloat16)   # (10, 20)
    w4 = params["w4t"].astype(jnp.bfloat16)   # (20, M)
    b1, b2, b3, b4 = params["b1"], params["b2"], params["b3"], params["b4"]

    const = lambda i: (0, 0)                  # weights/biases stay VMEM-resident
    out_bytes = jnp.dtype(out_dtype).itemsize

    # VMEM footprint: double-buffered activation blocks + single-buffered
    # constants (+ slack for compiler temporaries).
    # TODO(synk): for nbMovies large enough to overflow v7x's 64 MiB VMEM, add
    # a movie-axis-tiled path (3-D grid: "arbitrary" K-reduction for fc1 into a
    # (tb, 20) scratch + parallel movie tiles for fc4/output).
    need = (2 * tb * M * (4 + out_bytes)
            + (M * H1 + H1 * H2 + H2 * H1 + H1 * M) * 2
            + (H1 + H2 + H1 + M) * 4
            + (4 << 20))
    vmem_limit = int(min(max(need, 32 << 20), _physical_vmem_bytes() * 3 // 4))

    flops = 2 * Bp * (M * H1 + H1 * H2 + H2 * H1 + H1 * M)
    transcendentals = Bp * (H1 + H2 + H1)              # one exp per sigmoid elem
    bytes_accessed = (B * M * 4                        # x read (f32, no pad pass)
                      + B * M * out_bytes              # output write (bf16)
                      + (M * H1 + H1 * H2 + H2 * H1 + H1 * M) * 2   # bf16 weights
                      + (H1 + H2 + H1 + M) * 4)                     # f32 biases

    return pl.pallas_call(
        sae_kernel,
        out_shape=jax.ShapeDtypeStruct((B, M), out_dtype),
        grid=(n_tiles,),
        in_specs=[
            pl.BlockSpec((tb, M), lambda i: (i, 0)),   # x: pipelined over batch
            pl.BlockSpec((M, H1), const, pipeline_mode=pl.Buffered(1)),  # w1t
            pl.BlockSpec((1, H1), const),                                # b1
            pl.BlockSpec((H1, H2), const),                               # w2t
            pl.BlockSpec((1, H2), const),                                # b2
            pl.BlockSpec((H2, H1), const),                               # w3t
            pl.BlockSpec((1, H1), const),                                # b3
            pl.BlockSpec((H1, M), const, pipeline_mode=pl.Buffered(1)),  # w4t
            pl.BlockSpec((1, M), const, pipeline_mode=pl.Buffered(1)),   # b4
        ],
        out_specs=pl.BlockSpec((tb, M), lambda i: (i, 0)),
        compiler_params=pltpu.CompilerParams(
            # parallel batch axis -> sharded across both v7x TensorCores;
            # harmless no-op on single-TC v5e/v6e.
            dimension_semantics=("parallel",),
            vmem_limit_bytes=vmem_limit,
        ),
        cost_estimate=pl.CostEstimate(
            flops=flops,
            transcendentals=transcendentals,
            bytes_accessed=bytes_accessed),
    )(x, w1, b1, w2, b2, w3, b3, w4, b4)


def init_params(key, nb_movies):
    """Synthetic nn.Linear-style init: U(-1/sqrt(fan_in), 1/sqrt(fan_in)).

    All weights are stored transposed to (in, out) layout so every layer is a
    plain (batch, in) @ (in, out) MXU matmul:
      fc1 -> (nbMovies, 20), fc2 -> (20, 10), fc3 -> (10, 20), fc4 -> (20, nbMovies).
    """
    ks = jax.random.split(key, 8)

    def u(k, shape, fan_in):
        bound = 1.0 / (fan_in ** 0.5)
        return jax.random.uniform(k, shape, jnp.float32, -bound, bound)

    return {
        "w1t": u(ks[0], (nb_movies, H1), nb_movies),
        "b1": u(ks[1], (1, H1), nb_movies),
        "w2t": u(ks[2], (H1, H2), H1),
        "b2": u(ks[3], (1, H2), H1),
        "w3t": u(ks[4], (H2, H1), H2),
        "b3": u(ks[5], (1, H1), H2),
        "w4t": u(ks[6], (H1, nb_movies), H1),
        "b4": u(ks[7], (1, nb_movies), H1),
    }


def sae_reference(x, p):
    """Pure-JAX reference mirroring the kernel's bf16-input / f32-acc matmuls
    and the final bf16 downcast."""
    xb = x.astype(jnp.bfloat16)
    h = jax.nn.sigmoid(
        jnp.dot(xb, p["w1t"].astype(jnp.bfloat16),
                preferred_element_type=jnp.float32) + p["b1"])
    h = jax.nn.sigmoid(
        jnp.dot(h.astype(jnp.bfloat16), p["w2t"].astype(jnp.bfloat16),
                preferred_element_type=jnp.float32) + p["b2"])
    h = jax.nn.sigmoid(
        jnp.dot(h.astype(jnp.bfloat16), p["w3t"].astype(jnp.bfloat16),
                preferred_element_type=jnp.float32) + p["b3"])
    y = (jnp.dot(h.astype(jnp.bfloat16), p["w4t"].astype(jnp.bfloat16),
                 preferred_element_type=jnp.float32) + p["b4"])
    return y.astype(jnp.bfloat16)


if __name__ == "__main__":
    # TODO(synk): nbMovies comes from CSV files in the original script; use a
    # synthetic stand-in here (no file I/O allowed in this script).
    NB_MOVIES = 200   # not a multiple of 128 -> exercises the unpadded lane path
    BATCH = 200       # not a multiple of 128 -> exercises the partial batch tile

    key = jax.random.PRNGKey(0)
    kx, km = jax.random.split(key)
    # ratings in [0, 5], mostly zeros, like sparse user-movie rating vectors
    ratings = jnp.round(jax.random.uniform(kx, (BATCH, NB_MOVIES),
                                           jnp.float32, 0.0, 5.0))
    mask = (jax.random.uniform(km, (BATCH, NB_MOVIES)) > 0.8).astype(jnp.float32)
    x = ratings * mask

    params = init_params(jax.random.PRNGKey(42), NB_MOVIES)

    out = jax.block_until_ready(sae_forward(x, params))
    assert out.shape == (BATCH, NB_MOVIES)
    assert out.dtype == jnp.bfloat16

    ref = sae_reference(x, params)
    # bf16 output + possible exp-impl / accumulation-order differences between
    # Mosaic and XLA -> ~1e-2 tolerance (per review guidance).
    diff = jnp.max(jnp.abs(out.astype(jnp.float32) - ref.astype(jnp.float32)))
    assert jnp.allclose(out.astype(jnp.float32), ref.astype(jnp.float32),
                        atol=2e-2, rtol=2e-2), float(diff)

    print("KERNEL_OK")
</pallas_src>

<mosaic_0001>
module attributes {stable_mosaic.version = 11 : i64} {
  func.func @sae_kernel(%arg0: i32, %arg1: memref<128x200xf32, #tpu.memory_space<vmem>>, %arg2: memref<200x20xbf16, #tpu.memory_space<vmem>>, %arg3: memref<1x20xf32, #tpu.memory_space<vmem>>, %arg4: memref<20x10xbf16, #tpu.memory_space<vmem>>, %arg5: memref<1x10xf32, #tpu.memory_space<vmem>>, %arg6: memref<10x20xbf16, #tpu.memory_space<vmem>>, %arg7: memref<1x20xf32, #tpu.memory_space<vmem>>, %arg8: memref<20x200xbf16, #tpu.memory_space<vmem>>, %arg9: memref<1x200xf32, #tpu.memory_space<vmem>>, %arg10: memref<128x200xbf16, #tpu.memory_space<vmem>>) attributes {dimension_semantics = [#tpu.dimension_semantics<parallel>], iteration_bounds = array<i64: 2>, scalar_prefetch = 0 : i64, scratch_operands = 0 : i64, tpu.core_type = #tpu.core_type<tc>, window_params = [{transform_indices = @transform_0, window_bounds = array<i64: 128, 200>}, {pipeline_mode = #tpu.pipeline_mode<synchronous>, transform_indices = @transform_1, window_bounds = array<i64: 200, 20>}, {pipeline_mode = #tpu.pipeline_mode<synchronous>, transform_indices = @transform_2, window_bounds = array<i64: 1, 20>}, {pipeline_mode = #tpu.pipeline_mode<synchronous>, transform_indices = @transform_3, window_bounds = array<i64: 20, 10>}, {pipeline_mode = #tpu.pipeline_mode<synchronous>, transform_indices = @transform_4, window_bounds = array<i64: 1, 10>}, {pipeline_mode = #tpu.pipeline_mode<synchronous>, transform_indices = @transform_5, window_bounds = array<i64: 10, 20>}, {pipeline_mode = #tpu.pipeline_mode<synchronous>, transform_indices = @transform_6, window_bounds = array<i64: 1, 20>}, {pipeline_mode = #tpu.pipeline_mode<synchronous>, transform_indices = @transform_7, window_bounds = array<i64: 20, 200>}, {pipeline_mode = #tpu.pipeline_mode<synchronous>, transform_indices = @transform_8, window_bounds = array<i64: 1, 200>}, {transform_indices = @transform_9, window_bounds = array<i64: 128, 200>}]} {
    %c0 = arith.constant 0 : index
    %c0_0 = arith.constant 0 : index
    %0 = vector.load %arg1[%c0, %c0_0] : memref<128x200xf32, #tpu.memory_space<vmem>>, vector<128x200xf32>
    %1 = arith.truncf %0 : vector<128x200xf32> to vector<128x200xbf16>
    %c0_1 = arith.constant 0 : index
    %c0_2 = arith.constant 0 : index
    %2 = vector.load %arg2[%c0_1, %c0_2] : memref<200x20xbf16, #tpu.memory_space<vmem>>, vector<200x20xbf16>
    %cst = arith.constant dense<0.000000e+00> : vector<128x20xf32>
    %3 = tpu.matmul %1, %2, %cst {dimension_numbers = #tpu.dot_dimension_numbers<[1], [0], [0], [1], [0, 0, 1, 1], [], []>} : vector<128x200xbf16>, vector<200x20xbf16>, vector<128x20xf32> -> vector<128x20xf32>
    %c0_3 = arith.constant 0 : index
    %c0_4 = arith.constant 0 : index
    %4 = vector.load %arg3[%c0_3, %c0_4] : memref<1x20xf32, #tpu.memory_space<vmem>>, vector<1x20xf32>
    %5 = vector.broadcast %4 : vector<1x20xf32> to vector<128x20xf32>
    %6 = arith.addf %3, %5 : vector<128x20xf32>
    %7 = arith.negf %6 : vector<128x20xf32>
    %8 = math.exp %7 : vector<128x20xf32>
    %cst_5 = arith.constant 1.000000e+00 : f32
    %9 = vector.broadcast %cst_5 : f32 to vector<128x20xf32>
    %10 = arith.addf %9, %8 : vector<128x20xf32>
    %11 = arith.divf %9, %10 : vector<128x20xf32>
    %12 = arith.truncf %11 : vector<128x20xf32> to vector<128x20xbf16>
    %c0_6 = arith.constant 0 : index
    %c0_7 = arith.constant 0 : index
    %13 = vector.load %arg4[%c0_6, %c0_7] : memref<20x10xbf16, #tpu.memory_space<vmem>>, vector<20x10xbf16>
    %cst_8 = arith.constant dense<0.000000e+00> : vector<128x10xf32>
    %14 = tpu.matmul %12, %13, %cst_8 {dimension_numbers = #tpu.dot_dimension_numbers<[1], [0], [0], [1], [0, 0, 1, 1], [], []>} : vector<128x20xbf16>, vector<20x10xbf16>, vector<128x10xf32> -> vector<128x10xf32>
    %c0_9 = arith.constant 0 : index
    %c0_10 = arith.constant 0 : index
    %15 = vector.load %arg5[%c0_9, %c0_10] : memref<1x10xf32, #tpu.memory_space<vmem>>, vector<1x10xf32>
    %16 = vector.broadcast %15 : vector<1x10xf32> to vector<128x10xf32>
    %17 = arith.addf %14, %16 : vector<128x10xf32>
    %18 = arith.negf %17 : vector<128x10xf32>
    %19 = math.exp %18 : vector<128x10xf32>
    %cst_11 = arith.constant 1.000000e+00 : f32
    %20 = vector.broadcast %cst_11 : f32 to vector<128x10xf32>
    %21 = arith.addf %20, %19 : vector<128x10xf32>
    %22 = arith.divf %20, %21 : vector<128x10xf32>
    %23 = arith.truncf %22 : vector<128x10xf32> to vector<128x10xbf16>
    %c0_12 = arith.constant 0 : index
    %c0_13 = arith.constant 0 : index
    %24 = vector.load %arg6[%c0_12, %c0_13] : memref<10x20xbf16, #tpu.memory_space<vmem>>, vector<10x20xbf16>
    %cst_14 = arith.constant dense<0.000000e+00> : vector<128x20xf32>
    %25 = tpu.matmul %23, %24, %cst_14 {dimension_numbers = #tpu.dot_dimension_numbers<[1], [0], [0], [1], [0, 0, 1, 1], [], []>} : vector<128x10xbf16>, vector<10x20xbf16>, vector<128x20xf32> -> vector<128x20xf32>
    %c0_15 = arith.constant 0 : index
    %c0_16 = arith.constant 0 : index
    %26 = vector.load %arg7[%c0_15, %c0_16] : memref<1x20xf32, #tpu.memory_space<vmem>>, vector<1x20xf32>
    %27 = vector.broadcast %26 : vector<1x20xf32> to vector<128x20xf32>
    %28 = arith.addf %25, %27 : vector<128x20xf32>
    %29 = arith.negf %28 : vector<128x20xf32>
    %30 = math.exp %29 : vector<128x20xf32>
    %cst_17 = arith.constant 1.000000e+00 : f32
    %31 = vector.broadcast %cst_17 : f32 to vector<128x20xf32>
    %32 = arith.addf %31, %30 : vector<128x20xf32>
    %33 = arith.divf %31, %32 : vector<128x20xf32>
    %34 = arith.truncf %33 : vector<128x20xf32> to vector<128x20xbf16>
    %c0_18 = arith.constant 0 : index
    %c0_19 = arith.constant 0 : index
    %35 = vector.load %arg8[%c0_18, %c0_19] : memref<20x200xbf16, #tpu.memory_space<vmem>>, vector<20x200xbf16>
    %cst_20 = arith.constant dense<0.000000e+00> : vector<128x200xf32>
    %36 = tpu.matmul %34, %35, %cst_20 {dimension_numbers = #tpu.dot_dimension_numbers<[1], [0], [0], [1], [0, 0, 1, 1], [], []>} : vector<128x20xbf16>, vector<20x200xbf16>, vector<128x200xf32> -> vector<128x200xf32>
    %c0_21 = arith.constant 0 : index
    %c0_22 = arith.constant 0 : index
    %37 = vector.load %arg9[%c0_21, %c0_22] : memref<1x200xf32, #tpu.memory_space<vmem>>, vector<1x200xf32>
    %38 = vector.broadcast %37 : vector<1x200xf32> to vector<128x200xf32>
    %39 = arith.addf %36, %38 : vector<128x200xf32>
    %40 = arith.truncf %39 : vector<128x200xf32> to vector<128x200xbf16>
    %c0_23 = arith.constant 0 : index
    %c0_24 = arith.constant 0 : index
    %41 = vector.load %arg10[%c0_23, %c0_24] : memref<128x200xbf16, #tpu.memory_space<vmem>>, vector<128x200xbf16>
    tpu.vector_store %arg10[%c0_23, %c0_24], %40 {strides = array<i32>} : memref<128x200xbf16, #tpu.memory_space<vmem>>, vector<128x200xbf16>,
    return
  }
  func.func @transform_0(%arg0: i32) -> (i32, i32) {
    %c0_i32 = arith.constant 0 : i32
    %c0_i32_0 = arith.constant 0 : i32
    return %arg0, %c0_i32 : i32, i32
  }
  func.func @transform_1(%arg0: i32) -> (i32, i32) {
    %c0_i32 = arith.constant 0 : i32
    %c0_i32_0 = arith.constant 0 : i32
    %c0_i32_1 = arith.constant 0 : i32
    return %c0_i32, %c0_i32_0 : i32, i32
  }
  func.func @transform_2(%arg0: i32) -> (i32, i32) {
    %c0_i32 = arith.constant 0 : i32
    %c0_i32_0 = arith.constant 0 : i32
    %c0_i32_1 = arith.constant 0 : i32
    return %c0_i32, %c0_i32_0 : i32, i32
  }
  func.func @transform_3(%arg0: i32) -> (i32, i32) {
    %c0_i32 = arith.constant 0 : i32
    %c0_i32_0 = arith.constant 0 : i32
    %c0_i32_1 = arith.constant 0 : i32
    return %c0_i32, %c0_i32_0 : i32, i32
  }
  func.func @transform_4(%arg0: i32) -> (i32, i32) {
    %c0_i32 = arith.constant 0 : i32
    %c0_i32_0 = arith.constant 0 : i32
    %c0_i32_1 = arith.constant 0 : i32
    return %c0_i32, %c0_i32_0 : i32, i32
  }
  func.func @transform_5(%arg0: i32) -> (i32, i32) {
    %c0_i32 = arith.constant 0 : i32
    %c0_i32_0 = arith.constant 0 : i32
    %c0_i32_1 = arith.constant 0 : i32
    return %c0_i32, %c0_i32_0 : i32, i32
  }
  func.func @transform_6(%arg0: i32) -> (i32, i32) {
    %c0_i32 = arith.constant 0 : i32
    %c0_i32_0 = arith.constant 0 : i32
    %c0_i32_1 = arith.constant 0 : i32
    return %c0_i32, %c0_i32_0 : i32, i32
  }
  func.func @transform_7(%arg0: i32) -> (i32, i32) {
    %c0_i32 = arith.constant 0 : i32
    %c0_i32_0 = arith.constant 0 : i32
    %c0_i32_1 = arith.constant 0 : i32
    return %c0_i32, %c0_i32_0 : i32, i32
  }
  func.func @transform_8(%arg0: i32) -> (i32, i32) {
    %c0_i32 = arith.constant 0 : i32
    %c0_i32_0 = arith.constant 0 : i32
    %c0_i32_1 = arith.constant 0 : i32
    return %c0_i32, %c0_i32_0 : i32, i32
  }
  func.func @transform_9(%arg0: i32) -> (i32, i32) {
    %c0_i32 = arith.constant 0 : i32
    %c0_i32_0 = arith.constant 0 : i32
    return %arg0, %c0_i32 : i32, i32
  }
}

</mosaic_0001>

<bundles_post_ra>
// kernel: tpu_custom_call.1
= control target key start
LH: loop header
LB: loop body
LE: loop exit
PB: predicated region body
PF: predicated region fallthrough
CT: control target
= control target key end

     0   :  { %14 = vsyncpa [#allocation3], 0  ;;  %s3405_s0 = inlined_call_operand.hbm [shape: f32[200,200], index: 0, kind: input, shape index: {}]   ;;  %s3406_s1 = inlined_call_operand.vmem [shape: bf16[200,20], index: 1, kind: input, shape index: {}]   ;;  %s3407_s2 = inlined_call_operand.vmem [shape: f32[1,20], index: 2, kind: input, shape index: {}]   ;;  %s3408_s3 = inlined_call_operand.vmem [shape: bf16[20,10], index: 3, kind: input, shape index: {}]   ;;  %s3409_s4 = inlined_call_operand.vmem [shape: f32[1,10], index: 4, kind: input, shape index: {}]   ;;  %s3410_s5 = inlined_call_operand.vmem [shape: bf16[10,20], index: 5, kind: input, shape index: {}]   ;;  %s3411_s6 = inlined_call_operand.vmem [shape: f32[1,20], index: 6, kind: input, shape index: {}]   ;;  %s3412_s7 = inlined_call_operand.vmem [shape: bf16[20,200], index: 7, kind: input, shape index: {}]   ;;  %s3413_s8 = inlined_call_operand.vmem [shape: f32[1,200], index: 8, kind: input, shape index: {}]   ;;  %s3414_s9 = inlined_call_operand.hbm [shape: bf16[200,200], index: 9, kind: output, shape index: {}]  }
   0x1   :  { %16 = vsyncpa [#allocation3 + $0x1], 0 }
   0x2   :  { %17 = vsyncpa [#allocation4], 0 }
   0x3   :  { %19 = vsyncpa [#allocation4 + $0x1], 0  ;;  %s2672_s30 = smov 0   ;;  %s2674_s10 = smov 0  }
   0x4   :  { %s2676_s11 = smov 0   ;;  %s2678_s12 = smov 0  }
   0x5 LB: > { %3421 = sst [smem:[#allocation8_spill]] %s2610_s11  ;;  %s2693_s13 = sadd.s32 4294967295, %s2614_s12   ;;  %s2614_s12 = sphi %s2678_s12, %s3473_s12   ;;  %s2610_s11 = sphi %s2676_s11, %s3475_s11   ;;  %s2606_s10 = sphi %s2674_s10, %s3477_s10   ;;  %s2602_s30 = sphi %s2672_s30, %s3476_s30  }
   0x6   : > { %s2057_s14 = sadd.s32 4294967294, %s2614_s12   ;;  %s2697_s15 = sadd.s32 1, %s2614_s12  }
   0x7   : > { %3422 = sst [smem:[#allocation9_spill]] %s2697_s15  ;;  %s32_s16 = sadd.s32 1, %s2610_s11 }
   0x8   : > { %s29_s17 = ssub.s32 %s2614_s12, %s2697_s15  ;;  %p39_p0 = scmp.ne.s32.totalorder %s2610_s11, %s2606_s10 }
   0x9   : > { %p30_p1 = scmp.eq.s32.totalorder %s29_s17, 0  ;;  %p40_p2 = scmp.eq.s32.totalorder %s2614_s12, 0 }
   0xa   : > { %p45_p3 = scmp.ne.s32.totalorder %s2606_s10, %s2602_s30  ;;  %p46_p4 = scmp.eq.s32.totalorder %s2693_s13, 0 }
   0xb   : > { %s2709_s18 = scalar_select %p30_p1, %s2610_s11, %s32_s16  }
   0xc   : > { %p41_p5 = por %p40_p2, %p39_p0  ;;  %p2711_p6 = por %p46_p4, %p45_p3 }
   0xd   : > { %3423 = sst [smem:[#allocation10_spill]] %s2709_s18  ;;  %p237_p7 = scmp.eq.s32.totalorder %s2693_s13, 1 }
   0xe   : > { %p243_p8 = scmp.eq.s32.totalorder %s2057_s14, 1  ;;  %p3420_p11 = scmp.ge.s32.totalorder %s2614_s12, 2 }
   0xf   : > { %p2716_p9 = por %p237_p7, %p39_p0 }
  0x10   : > { %p2720_p10 = por %p243_p8, %p45_p3  ;;  %283 = sbr.rel (%p3420_p11) target bundleno = 58 (0x3a), region = 48 }
  0x12   : > { %s3426_s21 = scalar_select %p2720_p10, 1, 0 }
  0x14   : > { %3427 = sst [smem:[#allocation11_spill]] %s3426_s21 }
  0x15   : > { %286 = sbr.rel (!%p41_p5) target bundleno = 58 (0x3a), region = 52  ;;  %s287_s22 = sand.u32 (%p41_p5), 1, %s2610_s11  }
  0x16   : > { %s2061_s23 = sshll.u32 (%p41_p5), %s2614_s12, 4  ;;  %s2060_s24 = sshll.u32 (%p41_p5), %s287_s22, 8 }
  0x17   : > { %s293_s25 = ssub.s32 (%p41_p5), 25, %s2061_s23  ;;  %s2732_s29 = scalar_lea.sflag (%p41_p5), [#allocation3], %s287_s22 }
  0x18   : > { %p294_p12 = scmp.lt.s32.totalorder (%p41_p5), %s293_s25, 16  ;;  %s291_s14 = scalar_lea.vmem (%p41_p5), [#allocation2], %s2060_s24 }
  0x1a   : > { %s3479_s25 = smov (!%p294_p12, %s293_s25), 16 }
  0x1b   : > { %s2235_s26 = sshll.u32 %s3479_s25, 4 }
  0x1c   : > { %s298_s27 = ssub.s32 256, %s2235_s26 }
  0x1d   : > { %s299_s28 = sshll.u32 %s298_s27, 4 }
  0x1e   : > { %300 = vsyncadd %s2732_s29, %s299_s28  ;;  %p2735_p13 = scmp.ne.s32.totalorder %s2235_s26, 0  ;;  %s2237_s17 = sshll.u32 %s2614_s12, 8 }
  0x1f   : > { %s304_s11 = scalar_lea.hbm %s3405_s0, %s2237_s17  ;;  %s2743_s15 = sshll.u32 %s291_s14, 4  ;;  %s309_s15 = int_to_ptr.vmem [resolvable:$true] %s2743_s15 }
  0x20   : > { %s306_s22 = sshll.u32 %s304_s11, 4  ;;  %s3418_s24 = sshll.u32 %s3479_s25, 8  ;;  %s2746_s22 = int_to_ptr.hbm [resolvable:$true] %s306_s22 }
  0x21   : > { %s2498_s27 = sshra.s32 %s2746_s22, 4  ;;  %s2500_s26 = sshrl.u32 %s3418_s24, 4  ;;  %s2499_s27 = int_to_ptr.hbm [resolvable:$true] %s2498_s27 }
  0x22   : > { %s2505_s28 = scalar_lea.hbm %s2499_s27, %s2500_s26  ;;  %s2509_s14 = scalar_lea.hbm %s3405_s0, 400 }
  0x23   : > { %p2506_p0 = scmp.ne.s32.totalorder %s2499_s27, %s2505_s28  ;;  %p2510_p3 = scmp.lt.s32.totalorder %s2499_s27, %s3405_s0 }
  0x24   : > { %p2511_p4 = scmp.lt.s32.totalorder %s2509_s14, %s2505_s28 }
  0x25   : > { %p2507_p1 = pnand %p2506_p0, %p2735_p13 }
  0x26   : > { %p2512_p5 = por %p2511_p4, %p2510_p3 }
  0x27   : > { %p2508_p2 = pneg %p2507_p1 }
  0x29   : > { %p2513_p7 = pnand %p2512_p5, %p2508_p2 }
  0x2b   : > { %2516 = shalt.err (!%p2513_p7)
}
  0x2c   : > { %s2517_s24 = sshra.s32 %s309_s15, 4  ;;  %s2616_s18 = smov [#allocation2]   ;;  %s2518_s24 = int_to_ptr.vmem [resolvable:$true] %s2517_s24 }
  0x2d   : > { %s2524_s21 = scalar_lea.vmem %s2518_s24, %s2500_s26  ;;  %s2528_s17 = scalar_lea.vmem %s2616_s18, 512 }
  0x2e   : > { %p2525_p8 = scmp.ne.s32.totalorder %s2518_s24, %s2524_s21  ;;  %p2530_p1 = scmp.lt.s32.totalorder %s2528_s17, %s2524_s21 }
  0x30   : > { %p2526_p12 = pnand %p2525_p8, %p2735_p13 }
  0x32   : > { %p2527_p0 = pneg %p2526_p12 }
  0x34   : > { %p2532_p11 = pnand %p2530_p1, %p2527_p0 }
  0x36   : > { %2535 = shalt.err (!%p2532_p11)
}
  0x37   : > { %s2617_s27 = smov 256   ;;  %s2618_s28 = smov 16  }
  0x38   : > { %s3429_s14 = sshll.u32 %s3479_s25, 8 }
  0x39   : > { %314 = dma.hbm_to_vmem [thread:$0]  (%p2735_p13), %s2746_s22, %s3429_s14, %s309_s15, %s2732_s29, %s2617_s27, %s2617_s27, %s2618_s28  }
  0x3a PF: > { %p2069_p2 = scmp.ge.s32.totalorder %s2614_s12, 1  ;;  %p316_p3 = scmp.lt.s32.totalorder %s2614_s12, 3 }
  0x3c   : > { %p317_p4 = pnand %p2069_p2, %p316_p3 }
  0x3d   : > { %s2775_s21 = sand.u32 (!%p317_p4), 1, %s2606_s10  }
  0x3e   : > { %320 = sbr.rel (%p317_p4) target bundleno = 900 (0x384), region = 56  ;;  %s2070_s24 = sshll.u32 (!%p317_p4), %s2775_s21, 8 }
  0x3f   : > { %s323_s26 = scalar_lea.sflag (!%p317_p4), [#allocation3], %s2775_s21  ;;  %s2779_s16 = scalar_lea.vmem (!%p317_p4), [#allocation2], %s2070_s24 }
  0x43   : > { %2593 = dma.done.wait (%p2711_p6), %s323_s26, 4096  }
  0x44   : > { %2595 = vsyncadd (%p2711_p6), %s323_s26, 4294963200  ;;  %v2245_v0 = vld [vmem:[%s3406_s1 + $0x38] sm:$0xff]  ;;  %v447_v1 = vld [vmem:[%s3406_s1 + $0x60] sm:$0xf]  ;;  %vm552_vm0 = vcmask 1043456   ;;  %vm527_vm1 = vcmask 588800  }
  0x45   : > { %v501_v2 = vunpack.c.l.b16 %v447_v1  ;;  %556 = vmatpush.bf16.msra.mxu0 %v2245_v0  ;;  %v2244_v3 = vld [vmem:[%s3406_s1 + $0x30] sm:$0xff]  ;;  %v2243_v6 = vld [vmem:[%s3406_s1 + $0x28] sm:$0xff]  ;;  %v2249_v7 = vld [vmem:[%s3406_s1 + $0x58] sm:$0xff]  ;;  %vm1007_vm2 = vcmask 1041408   ;;  %vm982_vm11 = vcmask 162816   ;;  %s2071_s17 = sshll.u32 %s2775_s21, 7 }
  0x46   : > { %v2242_v8 = vld [vmem:[%s3406_s1 + $0x20] sm:$0xff]  ;;  %v2248_v9 = vld [vmem:[%s3406_s1 + $0x50] sm:$0xff]  ;;  %v2241_v10 = vld [vmem:[%s3406_s1 + $0x18] sm:$0xff]  ;;  %s3262_s27 = scalar_lea.vmem [#allocation5], %s2071_s17  ;;  %s1960_s28 = scalar_lea.sflag [#allocation4], %s2775_s21 }
  0x47   : > { %v514_v4 = vpack.c.b16 %v501_v2, %v501_v2  ;;  %v2247_v11 = vld [vmem:[%s3406_s1 + $0x48] sm:$0xff]  ;;  %v2240_v12 = vld [vmem:[%s3406_s1 + $0x10] sm:$0xff]  ;;  %v2246_v13 = vld [vmem:[%s3406_s1 + $0x40] sm:$0xff]  ;;  %s2225_s14 = sshll.u32 (%p2716_p9), %s2693_s13, 4 }
  0x48   : > { %v376_v14 = vld [vmem:[%s2779_s16 + $0x8] sm:$0xff]  ;;  %v378_v15 = vld [vmem:[%s2779_s16 + $0x18] sm:$0xff]  ;;  %v2238_v18 = vld [vmem:[%s3406_s1] sm:$0xff]  ;;  %s1968_s24 = ssub.s32 (%p2716_p9), 25, %s2225_s14 }
  0x49   : > { %v554_v5 = vsel %vm552_vm0, %v514_v4, 0  ;;  %557 = vmatpush.bf16.msra.mxu0 %v2244_v3  ;;  %v408_v16 = vpack.c.bf16 %v378_v15, %v376_v14  ;;  %v2239_v17 = vld [vmem:[%s3406_s1 + $0x8] sm:$0xff]  ;;  %v375_v19 = vld [vmem:[%s2779_s16] sm:$0xff]  ;;  %v377_v20 = vld [vmem:[%s2779_s16 + $0x10] sm:$0xff]  ;;  %p1969_p6 = scmp.lt.s32.totalorder (%p2716_p9), %s1968_s24, 16 }
  0x4a   : > { %608 = vmatpush.bf16.msra.mxu1 %v554_v5  ;;  %v407_v21 = vpack.c.bf16 %v377_v20, %v375_v19  ;;  %v380_v22 = vld [vmem:[%s2779_s16 + $0x28] sm:$0xff]  ;;  %v382_v23 = vld [vmem:[%s2779_s16 + $0x38] sm:$0xff]  ;;  %v379_v25 = vld [vmem:[%s2779_s16 + $0x20] sm:$0xff] }
  0x4b   : > { %v410_v24 = vpack.c.bf16 %v382_v23, %v380_v22  ;;  %v381_v26 = vld [vmem:[%s2779_s16 + $0x30] sm:$0xff]  ;;  %v968_v28 = vld [vmem:[%s3408_s3 + $0x8] sm:$0x3]  ;;  %v386_v30 = vld [vmem:[%s2779_s16 + $0x58] sm:$0xff] }
  0x4c   : > { %v409_v27 = vpack.c.bf16 %v381_v26, %v379_v25  ;;  %v384_v29 = vld [vmem:[%s2779_s16 + $0x48] sm:$0xff]  ;;  %v978_v31 = vunpack.c.l.b16 %v968_v28  ;;  %v383_v35 = vld [vmem:[%s2779_s16 + $0x40] sm:$0xff]  ;;  %v385_v36 = vld [vmem:[%s2779_s16 + $0x50] sm:$0xff] }
  0x4d   : > { %558 = vmatpush.bf16.msra.mxu0 %v2243_v6  ;;  %v412_v33 = vpack.c.bf16 %v386_v30, %v384_v29  ;;  %v411_v37 = vpack.c.bf16 %v385_v36, %v383_v35  ;;  %v388_v38 = vld [vmem:[%s2779_s16 + $0x68] sm:$0xff]  ;;  %v390_v39 = vld [vmem:[%s2779_s16 + $0x78] sm:$0xff]  ;;  %v387_v41 = vld [vmem:[%s2779_s16 + $0x60] sm:$0xff] }
  0x4e   : > { %609 = vmatpush.bf16.msra.mxu1 %v2249_v7  ;;  %v980_v32 = vpack.c.b16 %v978_v31, %v978_v31  ;;  %v414_v40 = vpack.c.bf16 %v390_v39, %v388_v38  ;;  %v389_v42 = vld [vmem:[%s2779_s16 + $0x70] sm:$0xff]  ;;  %v392_v44 = vld [vmem:[%s2779_s16 + $0x88] sm:$0xff]  ;;  %v394_v45 = vld [vmem:[%s2779_s16 + $0x98] sm:$0xff] }
  0x4f   : > { %v413_v43 = vpack.c.bf16 %v389_v42, %v387_v41  ;;  %v416_v46 = vpack.c.bf16 %v394_v45, %v392_v44  ;;  %v391_v47 = vld [vmem:[%s2779_s16 + $0x80] sm:$0xff]  ;;  %v393_v48 = vld [vmem:[%s2779_s16 + $0x90] sm:$0xff]  ;;  %v396_v50 = vld [vmem:[%s2779_s16 + $0xa8] sm:$0xff] }
  0x50   : > { %v1009_v34 = vsel %vm1007_vm2, %v980_v32, 0  ;;  %v415_v49 = vpack.c.bf16 %v393_v48, %v391_v47  ;;  %v398_v51 = vld [vmem:[%s2779_s16 + $0xb8] sm:$0xff]  ;;  %v395_v53 = vld [vmem:[%s2779_s16 + $0xa0] sm:$0xff]  ;;  %v397_v54 = vld [vmem:[%s2779_s16 + $0xb0] sm:$0xff] }
  0x51   : > { %559 = vmatpush.bf16.msra.mxu0 %v2242_v8  ;;  %2257 = vmatpush.bf16.msra.mxu2 %v1009_v34  ;;  %v418_v52 = vpack.c.bf16 %v398_v51, %v396_v50  ;;  %v417_v55 = vpack.c.bf16 %v397_v54, %v395_v53  ;;  %v2250_v56 = vld [vmem:[%s3408_s3] sm:$0xff]  ;;  %v400_v57 = vld [vmem:[%s2779_s16 + $0xc8] sm:$0xff]  ;;  %v402_v58 = vld [vmem:[%s2779_s16 + $0xd8] sm:$0xff] }
  0x52   : > { %610 = vmatpush.bf16.msra.mxu1 %v2248_v9  ;;  %v420_v59 = vpack.c.bf16 %v402_v58, %v400_v57  ;;  %v399_v60 = vld [vmem:[%s2779_s16 + $0xc0] sm:$0xff]  ;;  %v401_v61 = vld [vmem:[%s2779_s16 + $0xd0] sm:$0xff]  ;;  %v404_v63 = vld [vmem:[%s2779_s16 + $0xe8] sm:$0xff] }
  0x53   : > { %v419_v62 = vpack.c.bf16 %v401_v61, %v399_v60  ;;  %v406_v0 = vld [vmem:[%s2779_s16 + $0xf8] sm:$0xff]  ;;  %v403_v2 = vld [vmem:[%s2779_s16 + $0xe0] sm:$0xff]  ;;  %v405_v3 = vld [vmem:[%s2779_s16 + $0xf0] sm:$0xff] }
  0x54   : > { %v422_v1 = vpack.c.bf16 %v406_v0, %v404_v63  ;;  %v421_v4 = vpack.c.bf16 %v405_v3, %v403_v2  ;;  %v2875_v6 = vld [vmem:[%s3407_s2] ss:$0 sm:$0xff] }
  0x55   : > { %560 = vmatpush.bf16.msra.mxu0 %v2241_v10  ;;  %2258 = vmatpush.bf16.msra.mxu2 %v2250_v56 }
  0x56   : > { %611 = vmatpush.bf16.msra.mxu1 %v2247_v11 }
  0x59   : > { %561 = vmatpush.bf16.msra.mxu0 %v2240_v12 }
  0x5a   : > { %612 = vmatpush.bf16.msra.mxu1 %v2246_v13 }
  0x5d   : > { %2120 = vmatmul.msk.bf16.vlgmr.msra.gmra.mxu1 %vm527_vm1, %v408_v16  ;;  %562 = vmatpush.bf16.msra.mxu0 %v2239_v17 }
  0x5e   : > { %1017 = vmatpush.bf16.msrb.mxu1 %v1009_v34 }
  0x61   : > { %563 = vmatpush.bf16.msra.mxu0 %v2238_v18 }
  0x62   : > { %1018 = vmatpush.bf16.msrb.mxu1 %v2250_v56 }
  0x64   : > { %564 = vmatmul.bf16.vlgmr.msra.gmra.mxu0 %v407_v21 }
  0x6d   : > { %2121 = vmatmul.msk.bf16.gmra.mxu1 %vm527_vm1, %v410_v24 }
  0x74   : > { %569 = vmatmul.bf16.gmra.mxu0 %v409_v27 }
  0x7d   : > { %2122 = vmatmul.msk.bf16.gmra.mxu1 %vm527_vm1, %v412_v33 }
  0x84   : > { %574 = vmatmul.bf16.gmra.mxu0 %v411_v37 }
  0x8d   : > { %2123 = vmatmul.msk.bf16.gmra.mxu1 %vm527_vm1, %v414_v40 }
  0x94   : > { %579 = vmatmul.bf16.gmra.mxu0 %v413_v43 }
  0x9d   : > { %2124 = vmatmul.msk.bf16.gmra.mxu1 %vm527_vm1, %v416_v46 }
  0xa4   : > { %584 = vmatmul.bf16.gmra.mxu0 %v415_v49 }
  0xad   : > { %2125 = vmatmul.msk.bf16.gmra.mxu1 %vm527_vm1, %v418_v52 }
  0xb4   : > { %589 = vmatmul.bf16.gmra.mxu0 %v417_v55 }
  0xbd   : > { %2126 = vmatmul.msk.bf16.gmra.mxu1 %vm527_vm1, %v420_v59 }
  0xc4   : > { %594 = vmatmul.bf16.gmra.mxu0 %v419_v62 }
  0xcd   : > { %2127 = vmatmul.msk.bf16.gmra.mxu1 %vm527_vm1, %v422_v1 }
  0xd4   : > { %599 = vmatmul.bf16.gmra.mxu0 %v421_v4 }
  0xda   : > { %v614_v5 = vpop.f32.mrf.mxu1 }
  0xe1   : > { %v565_v7 = vpop.f32.mrf.mxu0 }
  0xe2   : > { %v616_v8 = vpop.f32.mrf.mxu1  ;;  %v566_v9 = vadd.f32 %v2875_v6, %v565_v7 }
  0xe4   : > { %v615_v10 = vadd.f32 %v614_v5, %v566_v9 }
  0xe6   : > { %v2128_v11 = vmul.f32 -1.442695, %v615_v10 }
  0xe8   : > { %2306 = vpow2.f32 %v2128_v11 }
  0xe9   : > { %v567_v12 = vpop.f32.mrf.mxu0 }
  0xea   : > { %v619_v13 = vpop.f32.mrf.mxu1  ;;  %v568_v14 = vadd.f32 %v2875_v6, %v567_v12 }
  0xec   : > { %v617_v15 = vadd.f32 %v616_v8, %v568_v14 }
  0xee   : > { %v2307_v16 = vpop.eup %2306  ;;  %v2129_v17 = vmul.f32 -1.442695, %v617_v15 }
  0xef   : > { %v702_v18 = vadd.f32 1.0, %v2307_v16 }
  0xf0   : > { %2308 = vpow2.f32 %v2129_v17 }
  0xf1   : > { %2310 = vrcp.f32 %v702_v18  ;;  %v570_v19 = vpop.f32.mrf.mxu0  ;;  %vm723_vm4 = vweird.f32 %v702_v18  ;;  %v727_v44 = vand.u32 2147483647, %v702_v18  ;;  %v729_v45 = vand.u32 2147483648, %v702_v18 }
  0xf2   : > { %v621_v20 = vpop.f32.mrf.mxu1  ;;  %v571_v21 = vadd.f32 %v2875_v6, %v570_v19 }
  0xf3   : > { %vm728_vm8 = vcmp.eq.f32.partialorder %v727_v44, 8.507059e+37  ;;  %v730_v57 = vor.u32 1.1754944e-38, %v729_v45 }
  0xf4   : > { %v620_v22 = vadd.f32 %v619_v13, %v571_v21 }
  0xf6   : > { %v2309_v23 = vpop.eup %2308  ;;  %v2130_v24 = vmul.f32 -1.442695, %v620_v22 }
  0xf7   : > { %v2311_v25 = vpop.eup %2310  ;;  %v703_v26 = vadd.f32 1.0, %v2309_v23 }
  0xf8   : > { %v719_v27 = vmul.f32 %v2311_v25, %v702_v18  ;;  %2312 = vpow2.f32 %v2130_v24  ;;  %vm724_vm3 = vweird.f32 %v2311_v25 }
  0xf9   : > { %2314 = vrcp.f32 %v703_v26  ;;  %v572_v28 = vpop.f32.mrf.mxu0  ;;  %v744_v46 = vand.u32 2147483648, %v703_v26  ;;  %v742_v49 = vand.u32 2147483647, %v703_v26  ;;  %vm2885_vm6 = vmor %vm723_vm4, %vm724_vm3  ;;  %vm738_vm7 = vweird.f32 %v703_v26 }
  0xfa   : > { %v624_v29 = vpop.f32.mrf.mxu1  ;;  %v720_v30 = vsub.f32 1.0, %v719_v27  ;;  %v573_v31 = vadd.f32 %v2875_v6, %v572_v28 }
  0xfb   : > { %v745_v58 = vor.u32 1.1754944e-38, %v744_v46  ;;  %vm743_vm10 = vcmp.eq.f32.partialorder %v742_v49, 8.507059e+37 }
  0xfc   : > { %v622_v32 = vadd.f32 %v621_v20, %v573_v31  ;;  %v721_v35 = vmul.f32 %v2311_v25, %v720_v30 }
  0xfe   : > { %v2313_v33 = vpop.eup %2312  ;;  %v2131_v34 = vmul.f32 -1.442695, %v622_v32  ;;  %v722_v43 = vadd.f32 %v2311_v25, %v721_v35 }
  0xff   : > { %v2315_v36 = vpop.eup %2314  ;;  %v2881_v37 = vadd.f32 1.0, %v2313_v33 }
 0x100   : > { %v734_v38 = vmul.f32 %v2315_v36, %v703_v26  ;;  %2316 = vpow2.f32 %v2131_v34  ;;  %vm739_vm5 = vweird.f32 %v2315_v36  ;;  %v726_v53 = vsel %vm2885_vm6, %v2311_v25, %v722_v43 }
 0x101   : > { %2318 = vrcp.f32 %v2881_v37  ;;  %v575_v39 = vpop.f32.mrf.mxu0  ;;  %vm740_vm9 = vmor %vm738_vm7, %vm739_vm5  ;;  %v731_v63 = vsel %vm728_vm8, %v730_v57, %v726_v53  ;;  %vm753_vm13 = vweird.f32 %v2881_v37  ;;  %v757_v17 = vand.u32 2147483647, %v2881_v37 }
 0x102   : > { %v626_v40 = vpop.f32.mrf.mxu1  ;;  %v735_v41 = vsub.f32 1.0, %v734_v38  ;;  %v576_v42 = vadd.f32 %v2875_v6, %v575_v39  ;;  %v759_v18 = vand.u32 2147483648, %v2881_v37 }
 0x103   : > { %vm758_vm3 = vcmp.eq.f32.partialorder %v757_v17, 8.507059e+37 }
 0x104   : > { %v625_v47 = vadd.f32 %v624_v29, %v576_v42  ;;  %v736_v48 = vmul.f32 %v2315_v36, %v735_v41  ;;  %v760_v30 = vor.u32 1.1754944e-38, %v759_v18 }
 0x106   : > { %v2317_v51 = vpop.eup %2316  ;;  %v2132_v52 = vmul.f32 -1.442695, %v625_v47  ;;  %v737_v54 = vadd.f32 %v2315_v36, %v736_v48 }
 0x107   : > { %v2891_v55 = vpop.eup %2318  ;;  %v705_v56 = vadd.f32 1.0, %v2317_v51 }
 0x108   : > { %2320 = vpow2.f32 %v2132_v52  ;;  %v741_v59 = vsel %vm740_vm9, %v2315_v36, %v737_v54  ;;  %v749_v60 = vmul.f32 %v2891_v55, %v2881_v37  ;;  %vm754_vm12 = vweird.f32 %v2891_v55 }
 0x109   : > { %2322 = vrcp.f32 %v705_v56  ;;  %v577_v61 = vpop.f32.mrf.mxu0  ;;  %v746_v0 = vsel %vm743_vm10, %v745_v58, %v741_v59  ;;  %v774_v19 = vand.u32 2147483648, %v705_v56  ;;  %v772_v22 = vand.u32 2147483647, %v705_v56  ;;  %vm2907_vm15 = vmor %vm753_vm13, %vm754_vm12 }
 0x10a   : > { %v629_v62 = vpop.f32.mrf.mxu1  ;;  %v578_v1 = vadd.f32 %v2875_v6, %v577_v61  ;;  %v958_v2 = vpack.c.bf16 %v746_v0, %v731_v63  ;;  %v750_v3 = vsub.f32 1.0, %v749_v60  ;;  %vm768_vm1 = vweird.f32 %v705_v56 }
 0x10b   : > { %v775_v31 = vor.u32 1.1754944e-38, %v774_v19  ;;  %vm773_vm5 = vcmp.eq.f32.partialorder %v772_v22, 8.507059e+37 }
 0x10c   : > { %v627_v4 = vadd.f32 %v626_v40, %v578_v1  ;;  %2148 = vmatmul.msk.bf16.vlgmr.msrb.gmra.mxu1 %vm982_vm11, %v958_v2  ;;  %v751_v8 = vmul.f32 %v2891_v55, %v750_v3 }
 0x10e   : > { %v2321_v5 = vpop.eup %2320  ;;  %v2133_v7 = vmul.f32 -1.442695, %v627_v4  ;;  %v752_v15 = vadd.f32 %v2891_v55, %v751_v8 }
 0x10f   : > { %v2323_v9 = vpop.eup %2322  ;;  %v2898_v10 = vadd.f32 1.0, %v2321_v5 }
 0x110   : > { %2324 = vpow2.f32 %v2133_v7  ;;  %v764_v11 = vmul.f32 %v2323_v9, %v705_v56  ;;  %vm769_vm14 = vweird.f32 %v2323_v9  ;;  %v756_v26 = vsel %vm2907_vm15, %v2891_v55, %v752_v15 }
 0x111   : > { %2326 = vrcp.f32 %v2898_v10  ;;  %v580_v12 = vpop.f32.mrf.mxu0  ;;  %vm770_vm4 = vmor %vm768_vm1, %vm769_vm14  ;;  %v761_v36 = vsel %vm758_vm3, %v760_v30, %v756_v26  ;;  %vm783_vm7 = vweird.f32 %v2898_v10  ;;  %v787_v53 = vand.u32 2147483647, %v2898_v10 }
 0x112   : > { %v631_v13 = vpop.f32.mrf.mxu1  ;;  %v581_v14 = vadd.f32 %v2875_v6, %v580_v12  ;;  %v765_v16 = vsub.f32 1.0, %v764_v11  ;;  %v789_v54 = vand.u32 2147483648, %v2898_v10  ;;  %v2174_v11 = vld [vmem:[%s3410_s5] sm:$0xf]  ;;  %v2251_v12 = vld [vmem:[%s3410_s5] sm:$0x10] }
 0x113   : > { %vm788_vm12 = vcmp.eq.f32.partialorder %v787_v53, 8.507059e+37  ;;  %vm1408_vm15 = vcmask 1044480  }
 0x114   : > { %v630_v20 = vadd.f32 %v629_v62, %v581_v14  ;;  %v766_v21 = vmul.f32 %v2323_v9, %v765_v16  ;;  %v790_v2 = vor.u32 1.1754944e-38, %v789_v54  ;;  %v2175_v16 = vor.u32 %v2251_v12, %v2174_v11 }
 0x116   : > { %v2325_v24 = vpop.eup %2324  ;;  %v2134_v25 = vmul.f32 -1.442695, %v630_v20  ;;  %v767_v27 = vadd.f32 %v2323_v9, %v766_v21  ;;  %v1410_v18 = vsel %vm1408_vm15, %v2175_v16, 0 }
 0x117   : > { %v2914_v28 = vpop.eup %2326  ;;  %v707_v29 = vadd.f32 1.0, %v2325_v24  ;;  %1419 = vmatpush.bf16.msrb.mxu0 %v1410_v18  ;;  %2259 = vmatpush.bf16.msra.mxu3 %v1410_v18 }
 0x118   : > { %2328 = vpow2.f32 %v2134_v25  ;;  %v771_v32 = vsel %vm770_vm4, %v2323_v9, %v767_v27  ;;  %v779_v33 = vmul.f32 %v2914_v28, %v2898_v10  ;;  %vm784_vm6 = vweird.f32 %v2914_v28 }
 0x119   : > { %2330 = vrcp.f32 %v707_v29  ;;  %v582_v34 = vpop.f32.mrf.mxu0  ;;  %v776_v37 = vsel %vm773_vm5, %v775_v31, %v771_v32  ;;  %v804_v55 = vand.u32 2147483648, %v707_v29  ;;  %v802_v58 = vand.u32 2147483647, %v707_v29  ;;  %vm2930_vm9 = vmor %vm783_vm7, %vm784_vm6 }
 0x11a   : > { %v634_v35 = vpop.f32.mrf.mxu1  ;;  %v583_v38 = vadd.f32 %v2875_v6, %v582_v34  ;;  %v959_v39 = vpack.c.bf16 %v776_v37, %v761_v36  ;;  %v780_v40 = vsub.f32 1.0, %v779_v33  ;;  %vm798_vm10 = vweird.f32 %v707_v29 }
 0x11b   : > { %v805_v3 = vor.u32 1.1754944e-38, %v804_v55  ;;  %vm803_vm14 = vcmp.eq.f32.partialorder %v802_v58, 8.507059e+37 }
 0x11c   : > { %v632_v41 = vadd.f32 %v631_v13, %v583_v38  ;;  %2149 = vmatmul.msk.bf16.gmra.mxu1 %vm982_vm11, %v959_v39  ;;  %v781_v44 = vmul.f32 %v2914_v28, %v780_v40 }
 0x11e   : > { %v2329_v42 = vpop.eup %2328  ;;  %v2135_v43 = vmul.f32 -1.442695, %v632_v41  ;;  %v782_v51 = vadd.f32 %v2914_v28, %v781_v44 }
 0x11f   : > { %v2331_v45 = vpop.eup %2330  ;;  %v2921_v46 = vadd.f32 1.0, %v2329_v42 }
 0x120   : > { %2332 = vpow2.f32 %v2135_v43  ;;  %v794_v47 = vmul.f32 %v2331_v45, %v707_v29  ;;  %vm799_vm8 = vweird.f32 %v2331_v45  ;;  %v786_v62 = vsel %vm2930_vm9, %v2914_v28, %v782_v51 }
 0x121   : > { %2334 = vrcp.f32 %v2921_v46  ;;  %v585_v48 = vpop.f32.mrf.mxu0  ;;  %vm800_vm13 = vmor %vm798_vm10, %vm799_vm8  ;;  %v791_v9 = vsel %vm788_vm12, %v790_v2, %v786_v62  ;;  %vm813_vm3 = vweird.f32 %v2921_v46  ;;  %v817_v30 = vand.u32 2147483647, %v2921_v46 }
 0x122   : > { %v636_v49 = vpop.f32.mrf.mxu1  ;;  %v586_v50 = vadd.f32 %v2875_v6, %v585_v48  ;;  %v795_v52 = vsub.f32 1.0, %v794_v47  ;;  %v819_v31 = vand.u32 2147483648, %v2921_v46 }
 0x123   : > { %vm818_vm7 = vcmp.eq.f32.partialorder %v817_v30, 8.507059e+37 }
 0x124   : > { %v635_v56 = vadd.f32 %v634_v35, %v586_v50  ;;  %v796_v57 = vmul.f32 %v2331_v45, %v795_v52  ;;  %v820_v43 = vor.u32 1.1754944e-38, %v819_v31 }
 0x126   : > { %v2333_v60 = vpop.eup %2332  ;;  %v2136_v61 = vmul.f32 -1.442695, %v635_v56  ;;  %v797_v63 = vadd.f32 %v2331_v45, %v796_v57 }
 0x127   : > { %v2937_v0 = vpop.eup %2334  ;;  %v2939_v1 = vadd.f32 1.0, %v2333_v60 }
 0x128   : > { %2336 = vpow2.f32 %v2136_v61  ;;  %v801_v4 = vsel %vm800_vm13, %v2331_v45, %v797_v63  ;;  %v809_v5 = vmul.f32 %v2937_v0, %v2921_v46  ;;  %vm814_vm1 = vweird.f32 %v2937_v0 }
 0x129   : > { %2338 = vrcp.f32 %v2939_v1  ;;  %v587_v7 = vpop.f32.mrf.mxu0  ;;  %v806_v10 = vsel %vm803_vm14, %v805_v3, %v801_v4  ;;  %v834_v32 = vand.u32 2147483648, %v2939_v1  ;;  %v832_v35 = vand.u32 2147483647, %v2939_v1  ;;  %vm2965_vm5 = vmor %vm813_vm3, %vm814_vm1 }
 0x12a   : > { %v639_v8 = vpop.f32.mrf.mxu1  ;;  %v588_v13 = vadd.f32 %v2875_v6, %v587_v7  ;;  %v960_v14 = vpack.c.bf16 %v806_v10, %v791_v9  ;;  %v810_v15 = vsub.f32 1.0, %v809_v5  ;;  %vm828_vm6 = vweird.f32 %v2939_v1 }
 0x12b   : > { %v835_v44 = vor.u32 1.1754944e-38, %v834_v32  ;;  %vm833_vm9 = vcmp.eq.f32.partialorder %v832_v35, 8.507059e+37 }
 0x12c   : > { %v637_v17 = vadd.f32 %v636_v49, %v588_v13  ;;  %2150 = vmatmul.msk.bf16.gmra.mxu1 %vm982_vm11, %v960_v14  ;;  %v811_v21 = vmul.f32 %v2937_v0, %v810_v15 }
 0x12e   : > { %v2337_v19 = vpop.eup %2336  ;;  %v2137_v20 = vmul.f32 -1.442695, %v637_v17  ;;  %v812_v27 = vadd.f32 %v2937_v0, %v811_v21 }
 0x12f   : > { %v2339_v22 = vpop.eup %2338  ;;  %v2953_v23 = vadd.f32 1.0, %v2337_v19 }
 0x130   : > { %2340 = vpow2.f32 %v2137_v20  ;;  %v824_v24 = vmul.f32 %v2339_v22, %v2939_v1  ;;  %vm829_vm4 = vweird.f32 %v2339_v22  ;;  %v816_v39 = vsel %vm2965_vm5, %v2937_v0, %v812_v27 }
 0x131   : > { %2342 = vrcp.f32 %v2953_v23  ;;  %v590_v25 = vpop.f32.mrf.mxu0  ;;  %vm830_vm8 = vmor %vm828_vm6, %vm829_vm4  ;;  %v821_v48 = vsel %vm818_vm7, %v820_v43, %v816_v39  ;;  %vm843_vm12 = vweird.f32 %v2953_v23  ;;  %v847_v1 = vand.u32 2147483647, %v2953_v23 }
 0x132   : > { %v591_v26 = vadd.f32 %v2875_v6, %v590_v25  ;;  %v825_v28 = vsub.f32 1.0, %v824_v24  ;;  %v641_v29 = vpop.f32.mrf.mxu1  ;;  %v849_v2 = vand.u32 2147483648, %v2953_v23 }
 0x133   : > { %vm848_vm1 = vcmp.eq.f32.partialorder %v847_v1, 8.507059e+37 }
 0x134   : > { %v640_v33 = vadd.f32 %v639_v8, %v591_v26  ;;  %v826_v34 = vmul.f32 %v2339_v22, %v825_v28  ;;  %v850_v16 = vor.u32 1.1754944e-38, %v849_v2 }
 0x136   : > { %v2341_v37 = vpop.eup %2340  ;;  %v2138_v38 = vmul.f32 -1.442695, %v640_v33  ;;  %v827_v40 = vadd.f32 %v2339_v22, %v826_v34 }
 0x137   : > { %v2343_v41 = vpop.eup %2342  ;;  %v711_v42 = vadd.f32 1.0, %v2341_v37 }
 0x138   : > { %2344 = vpow2.f32 %v2138_v38  ;;  %v831_v45 = vsel %vm830_vm8, %v2339_v22, %v827_v40  ;;  %v839_v46 = vmul.f32 %v2343_v41, %v2953_v23  ;;  %vm844_vm10 = vweird.f32 %v2343_v41 }
 0x139   : > { %2346 = vrcp.f32 %v711_v42  ;;  %v592_v47 = vpop.f32.mrf.mxu0  ;;  %v836_v49 = vsel %vm833_vm9, %v835_v44, %v831_v45  ;;  %v864_v3 = vand.u32 2147483648, %v711_v42  ;;  %v862_v7 = vand.u32 2147483647, %v711_v42  ;;  %vm2983_vm14 = vmor %vm843_vm12, %vm844_vm10  ;;  %v3022_v44 = vld [vmem:[%s3409_s4] ss:$0 sm:$0xff] }
 0x13a   : > { %v593_v50 = vadd.f32 %v2875_v6, %v592_v47  ;;  %v961_v51 = vpack.c.bf16 %v836_v49, %v821_v48  ;;  %v840_v52 = vsub.f32 1.0, %v839_v46  ;;  %v644_v54 = vpop.f32.mrf.mxu1  ;;  %vm858_vm15 = vweird.f32 %v711_v42 }
 0x13b   : > { %v865_v17 = vor.u32 1.1754944e-38, %v864_v3  ;;  %vm863_vm4 = vcmp.eq.f32.partialorder %v862_v7, 8.507059e+37 }
 0x13c   : > { %v642_v53 = vadd.f32 %v641_v29, %v593_v50  ;;  %2151 = vmatmul.msk.bf16.vlgmr.msra.gmra.mxu2 %vm982_vm11, %v961_v51  ;;  %v841_v57 = vmul.f32 %v2343_v41, %v840_v52 }
 0x13e   : > { %v2345_v55 = vpop.eup %2344  ;;  %v2139_v56 = vmul.f32 -1.442695, %v642_v53  ;;  %v842_v63 = vadd.f32 %v2343_v41, %v841_v57 }
 0x13f   : > { %v2347_v58 = vpop.eup %2346  ;;  %v2976_v59 = vadd.f32 1.0, %v2345_v55 }
 0x140   : > { %2348 = vpow2.f32 %v2139_v56  ;;  %v854_v60 = vmul.f32 %v2347_v58, %v711_v42  ;;  %vm859_vm13 = vweird.f32 %v2347_v58  ;;  %v846_v11 = vsel %vm2983_vm14, %v2343_v41, %v842_v63 }
 0x141   : > { %2350 = vrcp.f32 %v2976_v59  ;;  %v595_v61 = vpop.f32.mrf.mxu0  ;;  %vm860_vm3 = vmor %vm858_vm15, %vm859_vm13  ;;  %v851_v21 = vsel %vm848_vm1, %v850_v16, %v846_v11  ;;  %vm873_vm6 = vweird.f32 %v2976_v59  ;;  %v877_v38 = vand.u32 2147483647, %v2976_v59 }
 0x142   : > { %v596_v62 = vadd.f32 %v2875_v6, %v595_v61  ;;  %v855_v0 = vsub.f32 1.0, %v854_v60  ;;  %v646_v15 = vpop.f32.mrf.mxu1  ;;  %v879_v39 = vand.u32 2147483648, %v2976_v59 }
 0x143   : > { %vm878_vm10 = vcmp.eq.f32.partialorder %v877_v38, 8.507059e+37 }
 0x144   : > { %v645_v4 = vadd.f32 %v644_v54, %v596_v62  ;;  %v856_v5 = vmul.f32 %v2347_v58, %v855_v0  ;;  %v880_v51 = vor.u32 1.1754944e-38, %v879_v39 }
 0x146   : > { %v2349_v9 = vpop.eup %2348  ;;  %v2140_v10 = vmul.f32 -1.442695, %v645_v4  ;;  %v857_v12 = vadd.f32 %v2347_v58, %v856_v5 }
 0x147   : > { %v2351_v13 = vpop.eup %2350  ;;  %v713_v14 = vadd.f32 1.0, %v2349_v9 }
 0x148   : > { %2352 = vpow2.f32 %v2140_v10  ;;  %v861_v18 = vsel %vm860_vm3, %v2347_v58, %v857_v12  ;;  %v869_v19 = vmul.f32 %v2351_v13, %v2976_v59  ;;  %vm874_vm5 = vweird.f32 %v2351_v13 }
 0x149   : > { %2354 = vrcp.f32 %v713_v14  ;;  %v597_v20 = vpop.f32.mrf.mxu0  ;;  %v866_v22 = vsel %vm863_vm4, %v865_v17, %v861_v18  ;;  %v894_v40 = vand.u32 2147483648, %v713_v14  ;;  %v892_v43 = vand.u32 2147483647, %v713_v14  ;;  %vm2999_vm8 = vmor %vm873_vm6, %vm874_vm5 }
 0x14a   : > { %v598_v23 = vadd.f32 %v2875_v6, %v597_v20  ;;  %v962_v24 = vpack.c.bf16 %v866_v22, %v851_v21  ;;  %v870_v25 = vsub.f32 1.0, %v869_v19  ;;  %v649_v33 = vpop.f32.mrf.mxu1  ;;  %vm888_vm9 = vweird.f32 %v713_v14 }
 0x14b   : > { %v895_v52 = vor.u32 1.1754944e-38, %v894_v40  ;;  %vm893_vm13 = vcmp.eq.f32.partialorder %v892_v43, 8.507059e+37 }
 0x14c   : > { %v647_v26 = vadd.f32 %v646_v15, %v598_v23  ;;  %2152 = vmatmul.msk.bf16.gmra.mxu2 %vm982_vm11, %v962_v24  ;;  %v871_v29 = vmul.f32 %v2351_v13, %v870_v25 }
 0x14e   : > { %v2353_v27 = vpop.eup %2352  ;;  %v2141_v28 = vmul.f32 -1.442695, %v647_v26  ;;  %v872_v36 = vadd.f32 %v2351_v13, %v871_v29 }
 0x14f   : > { %v2355_v30 = vpop.eup %2354  ;;  %v2992_v31 = vadd.f32 1.0, %v2353_v27 }
 0x150   : > { %2356 = vpow2.f32 %v2141_v28  ;;  %v884_v32 = vmul.f32 %v2355_v30, %v713_v14  ;;  %vm889_vm7 = vweird.f32 %v2355_v30  ;;  %v876_v47 = vsel %vm2999_vm8, %v2351_v13, %v872_v36 }
 0x151   : > { %2358 = vrcp.f32 %v2992_v31  ;;  %v600_v34 = vpop.f32.mrf.mxu0  ;;  %vm890_vm12 = vmor %vm888_vm9, %vm889_vm7  ;;  %v881_v56 = vsel %vm878_vm10, %v880_v51, %v876_v47  ;;  %vm903_vm15 = vweird.f32 %v2992_v31  ;;  %v907_v9 = vand.u32 2147483647, %v2992_v31 }
 0x152   : > { %v601_v35 = vadd.f32 %v2875_v6, %v600_v34  ;;  %v885_v37 = vsub.f32 1.0, %v884_v32  ;;  %v651_v61 = vpop.f32.mrf.mxu1 }
 0x153   : > { %vm908_vm6 = vcmp.eq.f32.partialorder %v907_v9, 8.507059e+37 }
 0x154   : > { %v650_v41 = vadd.f32 %v649_v33, %v601_v35  ;;  %v886_v42 = vmul.f32 %v2355_v30, %v885_v37 }
 0x156   : > { %v2357_v45 = vpop.eup %2356  ;;  %v2142_v46 = vmul.f32 -1.442695, %v650_v41  ;;  %v887_v48 = vadd.f32 %v2355_v30, %v886_v42 }
 0x157   : > { %v2359_v49 = vpop.eup %2358  ;;  %v715_v50 = vadd.f32 1.0, %v2357_v45 }
 0x158   : > { %2360 = vpow2.f32 %v2142_v46  ;;  %v891_v53 = vsel %vm890_vm12, %v2355_v30, %v887_v48  ;;  %v899_v54 = vmul.f32 %v2359_v49, %v2992_v31  ;;  %vm904_vm14 = vweird.f32 %v2359_v49 }
 0x159   : > { %2362 = vrcp.f32 %v715_v50  ;;  %v602_v55 = vpop.f32.mrf.mxu0  ;;  %v896_v57 = vsel %vm893_vm13, %v895_v52, %v891_v53  ;;  %v924_v8 = vand.u32 2147483648, %v715_v50  ;;  %v922_v11 = vand.u32 2147483647, %v715_v50  ;;  %vm3011_vm3 = vmor %vm903_vm15, %vm904_vm14 }
 0x15a   : > { %v603_v58 = vadd.f32 %v2875_v6, %v602_v55  ;;  %v963_v59 = vpack.c.bf16 %v896_v57, %v881_v56  ;;  %v900_v60 = vsub.f32 1.0, %v899_v54  ;;  %v909_v6 = vand.u32 2147483648, %v2992_v31 }
 0x15b   : > { %vm918_vm4 = vweird.f32 %v715_v50  ;;  %v925_v19 = vor.u32 1.1754944e-38, %v924_v8  ;;  %vm923_vm7 = vcmp.eq.f32.partialorder %v922_v11, 8.507059e+37 }
 0x15c   : > { %v652_v62 = vadd.f32 %v651_v61, %v603_v58  ;;  %2153 = vmatmul.msk.bf16.gmra.mxu2 %vm982_vm11, %v963_v59  ;;  %v901_v1 = vmul.f32 %v2359_v49, %v900_v60  ;;  %v910_v18 = vor.u32 1.1754944e-38, %v909_v6 }
 0x15e   : > { %v2361_v63 = vpop.eup %2360  ;;  %v2143_v0 = vmul.f32 -1.442695, %v652_v62  ;;  %v902_v5 = vadd.f32 %v2359_v49, %v901_v1 }
 0x15f   : > { %v2363_v2 = vpop.eup %2362  ;;  %v716_v3 = vadd.f32 1.0, %v2361_v63 }
 0x160   : > { %2364 = vpow2.f32 %v2143_v0  ;;  %v914_v4 = vmul.f32 %v2363_v2, %v715_v50  ;;  %vm919_vm1 = vweird.f32 %v2363_v2  ;;  %v906_v14 = vsel %vm3011_vm3, %v2359_v49, %v902_v5 }
 0x161   : > { %2366 = vrcp.f32 %v716_v3  ;;  %vm920_vm5 = vmor %vm918_vm4, %vm919_vm1  ;;  %v911_v22 = vsel %vm908_vm6, %v910_v18, %v906_v14  ;;  %vm933_vm9 = vweird.f32 %v716_v3  ;;  %v939_v31 = vand.u32 2147483648, %v716_v3 }
 0x162   : > { %v915_v7 = vsub.f32 1.0, %v914_v4  ;;  %v937_v33 = vand.u32 2147483647, %v716_v3 }
 0x163   : > { %v940_v38 = vor.u32 1.1754944e-38, %v939_v31 }
 0x164   : > { %v916_v10 = vmul.f32 %v2363_v2, %v915_v7  ;;  %vm938_vm15 = vcmp.eq.f32.partialorder %v937_v33, 8.507059e+37 }
 0x166   : > { %v2365_v13 = vpop.eup %2364  ;;  %v917_v15 = vadd.f32 %v2363_v2, %v916_v10 }
 0x167   : > { %v2367_v16 = vpop.eup %2366  ;;  %v717_v17 = vadd.f32 1.0, %v2365_v13 }
 0x168   : > { %v921_v20 = vsel %vm920_vm5, %v2363_v2, %v917_v15  ;;  %v929_v21 = vmul.f32 %v2367_v16, %v716_v3  ;;  %vm934_vm8 = vweird.f32 %v2367_v16 }
 0x169   : > { %2368 = vrcp.f32 %v717_v17  ;;  %v926_v23 = vsel %vm923_vm7, %v925_v19, %v921_v20  ;;  %v954_v32 = vand.u32 2147483648, %v717_v17  ;;  %v952_v35 = vand.u32 2147483647, %v717_v17  ;;  %vm935_vm12 = vmor %vm933_vm9, %vm934_vm8 }
 0x16a   : > { %v964_v24 = vpack.c.bf16 %v926_v23, %v911_v22  ;;  %v930_v25 = vsub.f32 1.0, %v929_v21  ;;  %vm948_vm13 = vweird.f32 %v717_v17 }
 0x16b   : > { %v955_v39 = vor.u32 1.1754944e-38, %v954_v32  ;;  %vm953_vm1 = vcmp.eq.f32.partialorder %v952_v35, 8.507059e+37 }
 0x16c   : > { %2154 = vmatmul.msk.bf16.gmra.mxu2 %vm982_vm11, %v964_v24  ;;  %v931_v26 = vmul.f32 %v2367_v16, %v930_v25 }
 0x16e   : > { %v932_v29 = vadd.f32 %v2367_v16, %v931_v26 }
 0x16f   : > { %v2369_v27 = vpop.eup %2368 }
 0x170   : > { %v944_v28 = vmul.f32 %v2369_v27, %v717_v17  ;;  %vm949_vm10 = vweird.f32 %v2369_v27  ;;  %v936_v36 = vsel %vm935_vm12, %v2367_v16, %v932_v29  ;;  %vm1383_vm12 = vcmask 80896  }
 0x171   : > { %vm950_vm14 = vmor %vm948_vm13, %vm949_vm10  ;;  %v941_v41 = vsel %vm938_vm15, %v940_v38, %v936_v36 }
 0x172   : > { %v945_v30 = vsub.f32 1.0, %v944_v28 }
 0x174   : > { %v946_v34 = vmul.f32 %v2369_v27, %v945_v30 }
 0x176   : > { %v947_v37 = vadd.f32 %v2369_v27, %v946_v34 }
 0x178   : > { %v951_v40 = vsel %vm950_vm14, %v2369_v27, %v947_v37 }
 0x179   : > { %v956_v42 = vsel %vm953_vm1, %v955_v39, %v951_v40 }
 0x17a   : > { %v965_v43 = vpack.c.bf16 %v956_v42, %v941_v41 }
 0x17c   : > { %2155 = vmatmul.msk.bf16.gmra.mxu2 %vm982_vm11, %v965_v43 }
 0x189   : > { %v1020_v45 = vpop.f32.mrf.mxu1 }
 0x18a   : > { %v1021_v46 = vadd.f32 %v3022_v44, %v1020_v45 }
 0x18c   : > { %v2156_v47 = vmul.f32 -1.442695, %v1021_v46 }
 0x18e   : > { %2370 = vpow2.f32 %v2156_v47 }
 0x191   : > { %v1022_v48 = vpop.f32.mrf.mxu1 }
 0x192   : > { %v1023_v49 = vadd.f32 %v3022_v44, %v1022_v48 }
 0x194   : > { %v2371_v50 = vpop.eup %2370  ;;  %v2157_v51 = vmul.f32 -1.442695, %v1023_v49 }
 0x195   : > { %v1108_v52 = vadd.f32 1.0, %v2371_v50 }
 0x196   : > { %2372 = vpow2.f32 %v2157_v51 }
 0x197   : > { %2374 = vrcp.f32 %v1108_v52  ;;  %vm1129_vm4 = vweird.f32 %v1108_v52  ;;  %v1133_v8 = vand.u32 2147483647, %v1108_v52  ;;  %v1135_v9 = vand.u32 2147483648, %v1108_v52 }
 0x199   : > { %v1025_v53 = vpop.f32.mrf.mxu1  ;;  %vm1134_vm8 = vcmp.eq.f32.partialorder %v1133_v8, 8.507059e+37  ;;  %v1136_v21 = vor.u32 1.1754944e-38, %v1135_v9 }
 0x19a   : > { %v1026_v54 = vadd.f32 %v3022_v44, %v1025_v53 }
 0x19c   : > { %v2373_v55 = vpop.eup %2372  ;;  %v2158_v56 = vmul.f32 -1.442695, %v1026_v54 }
 0x19d   : > { %v2375_v57 = vpop.eup %2374  ;;  %v1109_v58 = vadd.f32 1.0, %v2373_v55 }
 0x19e   : > { %v1125_v59 = vmul.f32 %v2375_v57, %v1108_v52  ;;  %2376 = vpow2.f32 %v2158_v56  ;;  %vm1130_vm3 = vweird.f32 %v2375_v57 }
 0x19f   : > { %2378 = vrcp.f32 %v1109_v58  ;;  %v1150_v10 = vand.u32 2147483648, %v1109_v58  ;;  %v1148_v13 = vand.u32 2147483647, %v1109_v58  ;;  %vm3032_vm6 = vmor %vm1129_vm4, %vm1130_vm3  ;;  %vm1144_vm7 = vweird.f32 %v1109_v58 }
 0x1a0   : > { %v1126_v60 = vsub.f32 1.0, %v1125_v59 }
 0x1a1   : > { %v1027_v61 = vpop.f32.mrf.mxu1  ;;  %v1151_v22 = vor.u32 1.1754944e-38, %v1150_v10  ;;  %vm1149_vm10 = vcmp.eq.f32.partialorder %v1148_v13, 8.507059e+37 }
 0x1a2   : > { %v1028_v62 = vadd.f32 %v3022_v44, %v1027_v61  ;;  %v1127_v1 = vmul.f32 %v2375_v57, %v1126_v60 }
 0x1a4   : > { %v2377_v63 = vpop.eup %2376  ;;  %v2159_v0 = vmul.f32 -1.442695, %v1028_v62  ;;  %v1128_v7 = vadd.f32 %v2375_v57, %v1127_v1 }
 0x1a5   : > { %v2379_v2 = vpop.eup %2378  ;;  %v3028_v3 = vadd.f32 1.0, %v2377_v63 }
 0x1a6   : > { %v1140_v4 = vmul.f32 %v2379_v2, %v1109_v58  ;;  %2380 = vpow2.f32 %v2159_v0  ;;  %vm1145_vm5 = vweird.f32 %v2379_v2  ;;  %v1132_v17 = vsel %vm3032_vm6, %v2375_v57, %v1128_v7 }
 0x1a7   : > { %2382 = vrcp.f32 %v3028_v3  ;;  %vm1146_vm9 = vmor %vm1144_vm7, %vm1145_vm5  ;;  %v1137_v25 = vsel %vm1134_vm8, %v1136_v21, %v1132_v17  ;;  %vm1159_vm14 = vweird.f32 %v3028_v3  ;;  %v1165_v39 = vand.u32 2147483648, %v3028_v3 }
 0x1a8   : > { %v1141_v5 = vsub.f32 1.0, %v1140_v4  ;;  %v1163_v41 = vand.u32 2147483647, %v3028_v3 }
 0x1a9   : > { %v1030_v6 = vpop.f32.mrf.mxu1  ;;  %v1166_v51 = vor.u32 1.1754944e-38, %v1165_v39 }
 0x1aa   : > { %v1031_v11 = vadd.f32 %v3022_v44, %v1030_v6  ;;  %v1142_v12 = vmul.f32 %v2379_v2, %v1141_v5  ;;  %vm1164_vm5 = vcmp.eq.f32.partialorder %v1163_v41, 8.507059e+37 }
 0x1ac   : > { %v2381_v15 = vpop.eup %2380  ;;  %v2160_v16 = vmul.f32 -1.442695, %v1031_v11  ;;  %v1143_v18 = vadd.f32 %v2379_v2, %v1142_v12 }
 0x1ad   : > { %v2383_v19 = vpop.eup %2382  ;;  %v1111_v20 = vadd.f32 1.0, %v2381_v15 }
 0x1ae   : > { %v1155_v23 = vmul.f32 %v2383_v19, %v3028_v3  ;;  %2384 = vpow2.f32 %v2160_v16  ;;  %v1147_v24 = vsel %vm1146_vm9, %v2379_v2, %v1143_v18  ;;  %vm1160_vm13 = vweird.f32 %v2383_v19 }
 0x1af   : > { %2386 = vrcp.f32 %v1111_v20  ;;  %v1152_v26 = vsel %vm1149_vm10, %v1151_v22, %v1147_v24  ;;  %v1180_v40 = vand.u32 2147483648, %v1111_v20  ;;  %v1178_v43 = vand.u32 2147483647, %v1111_v20  ;;  %vm3047_vm1 = vmor %vm1159_vm14, %vm1160_vm13 }
 0x1b0   : > { %v1364_v27 = vpack.c.bf16 %v1152_v26, %v1137_v25  ;;  %v1156_v28 = vsub.f32 1.0, %v1155_v23  ;;  %vm1174_vm3 = vweird.f32 %v1111_v20 }
 0x1b1   : > { %v1032_v29 = vpop.f32.mrf.mxu1  ;;  %v1181_v52 = vor.u32 1.1754944e-38, %v1180_v40  ;;  %vm1179_vm6 = vcmp.eq.f32.partialorder %v1178_v43, 8.507059e+37 }
 0x1b2   : > { %v1033_v30 = vadd.f32 %v3022_v44, %v1032_v29  ;;  %2176 = vmatmul.msk.bf16.vlgmr.msrb.gmra.mxu0 %vm1383_vm12, %v1364_v27  ;;  %v1157_v33 = vmul.f32 %v2383_v19, %v1156_v28 }
 0x1b4   : > { %v2385_v31 = vpop.eup %2384  ;;  %v2161_v32 = vmul.f32 -1.442695, %v1033_v30  ;;  %v1158_v37 = vadd.f32 %v2383_v19, %v1157_v33 }
 0x1b5   : > { %v2387_v34 = vpop.eup %2386  ;;  %v3041_v35 = vadd.f32 1.0, %v2385_v31 }
 0x1b6   : > { %v1170_v36 = vmul.f32 %v2387_v34, %v1111_v20  ;;  %2388 = vpow2.f32 %v2161_v32  ;;  %vm1175_vm15 = vweird.f32 %v2387_v34  ;;  %v1162_v47 = vsel %vm3047_vm1, %v2383_v19, %v1158_v37 }
 0x1b7   : > { %2390 = vrcp.f32 %v3041_v35  ;;  %vm1176_vm4 = vmor %vm1174_vm3, %vm1175_vm15  ;;  %v1167_v56 = vsel %vm1164_vm5, %v1166_v51, %v1162_v47  ;;  %vm1189_vm8 = vweird.f32 %v3041_v35  ;;  %v1193_v5 = vand.u32 2147483647, %v3041_v35 }
 0x1b8   : > { %v1171_v38 = vsub.f32 1.0, %v1170_v36  ;;  %v1195_v7 = vand.u32 2147483648, %v3041_v35 }
 0x1b9   : > { %vm1194_vm15 = vcmp.eq.f32.partialorder %v1193_v5, 8.507059e+37 }
 0x1ba   : > { %v1172_v42 = vmul.f32 %v2387_v34, %v1171_v38  ;;  %v1196_v15 = vor.u32 1.1754944e-38, %v1195_v7 }
 0x1bc   : > { %v2389_v46 = vpop.eup %2388  ;;  %v1173_v48 = vadd.f32 %v2387_v34, %v1172_v42 }
 0x1bd   : > { %v2391_v49 = vpop.eup %2390  ;;  %v1113_v50 = vadd.f32 1.0, %v2389_v46 }
 0x1be   : > { %v1185_v53 = vmul.f32 %v2391_v49, %v3041_v35  ;;  %v1177_v54 = vsel %vm1176_vm4, %v2387_v34, %v1173_v48  ;;  %vm1190_vm7 = vweird.f32 %v2391_v49 }
 0x1bf   : > { %2392 = vrcp.f32 %v1113_v50  ;;  %v1035_v55 = vpop.f32.mrf.mxu2  ;;  %v1182_v57 = vsel %vm1179_vm6, %v1181_v52, %v1177_v54  ;;  %v1210_v6 = vand.u32 2147483648, %v1113_v50  ;;  %v1208_v11 = vand.u32 2147483647, %v1113_v50  ;;  %vm1191_vm10 = vmor %vm1189_vm8, %vm1190_vm7 }
 0x1c0   : > { %v1036_v58 = vadd.f32 %v3022_v44, %v1035_v55  ;;  %v1365_v59 = vpack.c.bf16 %v1182_v57, %v1167_v56  ;;  %v1186_v60 = vsub.f32 1.0, %v1185_v53  ;;  %vm1204_vm13 = vweird.f32 %v1113_v50 }
 0x1c1   : > { %v1211_v16 = vor.u32 1.1754944e-38, %v1210_v6  ;;  %vm1209_vm1 = vcmp.eq.f32.partialorder %v1208_v11, 8.507059e+37 }
 0x1c2   : > { %v2162_v61 = vmul.f32 -1.442695, %v1036_v58  ;;  %2177 = vmatmul.msk.bf16.gmra.mxu0 %vm1383_vm12, %v1365_v59  ;;  %v1187_v62 = vmul.f32 %v2391_v49, %v1186_v60 }
 0x1c4   : > { %2394 = vpow2.f32 %v2162_v61  ;;  %v1188_v3 = vadd.f32 %v2391_v49, %v1187_v62 }
 0x1c5   : > { %v2393_v63 = vpop.eup %2392 }
 0x1c6   : > { %v1200_v0 = vmul.f32 %v2393_v63, %v1113_v50  ;;  %vm1205_vm9 = vweird.f32 %v2393_v63  ;;  %v1192_v13 = vsel %vm1191_vm10, %v2391_v49, %v1188_v3 }
 0x1c7   : > { %v1037_v1 = vpop.f32.mrf.mxu2  ;;  %vm1206_vm14 = vmor %vm1204_vm13, %vm1205_vm9  ;;  %v1197_v19 = vsel %vm1194_vm15, %v1196_v15, %v1192_v13 }
 0x1c8   : > { %v1038_v2 = vadd.f32 %v3022_v44, %v1037_v1  ;;  %v1201_v4 = vsub.f32 1.0, %v1200_v0 }
 0x1ca   : > { %v2395_v8 = vpop.eup %2394  ;;  %v2163_v9 = vmul.f32 -1.442695, %v1038_v2  ;;  %v1202_v10 = vmul.f32 %v2393_v63, %v1201_v4 }
 0x1cb   : > { %v1114_v12 = vadd.f32 1.0, %v2395_v8 }
 0x1cc   : > { %2396 = vpow2.f32 %v2163_v9  ;;  %v1203_v14 = vadd.f32 %v2393_v63, %v1202_v10 }
 0x1cd   : > { %2398 = vrcp.f32 %v1114_v12  ;;  %vm1219_vm4 = vweird.f32 %v1114_v12  ;;  %v1223_v40 = vand.u32 2147483647, %v1114_v12  ;;  %v1225_v41 = vand.u32 2147483648, %v1114_v12 }
 0x1ce   : > { %v1207_v17 = vsel %vm1206_vm14, %v2393_v63, %v1203_v14 }
 0x1cf   : > { %v1040_v18 = vpop.f32.mrf.mxu2  ;;  %v1212_v20 = vsel %vm1209_vm1, %v1211_v16, %v1207_v17  ;;  %vm1224_vm8 = vcmp.eq.f32.partialorder %v1223_v40, 8.507059e+37  ;;  %v1226_v54 = vor.u32 1.1754944e-38, %v1225_v41 }
 0x1d0   : > { %v1041_v21 = vadd.f32 %v3022_v44, %v1040_v18  ;;  %v1366_v22 = vpack.c.bf16 %v1212_v20, %v1197_v19 }
 0x1d2   : > { %v2397_v23 = vpop.eup %2396  ;;  %v2164_v24 = vmul.f32 -1.442695, %v1041_v21  ;;  %2178 = vmatmul.msk.bf16.gmra.mxu0 %vm1383_vm12, %v1366_v22 }
 0x1d3   : > { %v2399_v25 = vpop.eup %2398  ;;  %v1115_v26 = vadd.f32 1.0, %v2397_v23 }
 0x1d4   : > { %v1215_v27 = vmul.f32 %v2399_v25, %v1114_v12  ;;  %2400 = vpow2.f32 %v2164_v24  ;;  %vm1220_vm3 = vweird.f32 %v2399_v25 }
 0x1d5   : > { %2402 = vrcp.f32 %v1115_v26  ;;  %v1240_v42 = vand.u32 2147483648, %v1115_v26  ;;  %v1238_v46 = vand.u32 2147483647, %v1115_v26  ;;  %vm3067_vm6 = vmor %vm1219_vm4, %vm1220_vm3  ;;  %vm1234_vm7 = vweird.f32 %v1115_v26 }
 0x1d6   : > { %v1216_v28 = vsub.f32 1.0, %v1215_v27 }
 0x1d7   : > { %v1042_v29 = vpop.f32.mrf.mxu2  ;;  %v1241_v55 = vor.u32 1.1754944e-38, %v1240_v42  ;;  %vm1239_vm10 = vcmp.eq.f32.partialorder %v1238_v46, 8.507059e+37 }
 0x1d8   : > { %v1043_v30 = vadd.f32 %v3022_v44, %v1042_v29  ;;  %v1217_v33 = vmul.f32 %v2399_v25, %v1216_v28 }
 0x1da   : > { %v2401_v31 = vpop.eup %2400  ;;  %v2165_v32 = vmul.f32 -1.442695, %v1043_v30  ;;  %v1218_v37 = vadd.f32 %v2399_v25, %v1217_v33 }
 0x1db   : > { %v2403_v34 = vpop.eup %2402  ;;  %v3063_v35 = vadd.f32 1.0, %v2401_v31 }
 0x1dc   : > { %2404 = vpow2.f32 %v2165_v32  ;;  %v1230_v36 = vmul.f32 %v2403_v34, %v1115_v26  ;;  %vm1235_vm5 = vweird.f32 %v2403_v34  ;;  %v1222_v50 = vsel %vm3067_vm6, %v2399_v25, %v1218_v37 }
 0x1dd   : > { %2406 = vrcp.f32 %v3063_v35  ;;  %vm1236_vm9 = vmor %vm1234_vm7, %vm1235_vm5  ;;  %v1227_v58 = vsel %vm1224_vm8, %v1226_v54, %v1222_v50  ;;  %vm1249_vm14 = vweird.f32 %v3063_v35  ;;  %v1253_v9 = vand.u32 2147483647, %v3063_v35 }
 0x1de   : > { %v1231_v38 = vsub.f32 1.0, %v1230_v36  ;;  %v1255_v10 = vand.u32 2147483648, %v3063_v35 }
 0x1df   : > { %v1045_v39 = vpop.f32.mrf.mxu2  ;;  %vm1254_vm4 = vcmp.eq.f32.partialorder %v1253_v9, 8.507059e+37 }
 0x1e0   : > { %v1046_v43 = vadd.f32 %v3022_v44, %v1045_v39  ;;  %v1232_v45 = vmul.f32 %v2403_v34, %v1231_v38  ;;  %v1256_v22 = vor.u32 1.1754944e-38, %v1255_v10  ;;  %v1775_v38 = vld [vmem:[%s3412_s7 + $0x10] sm:$0x33] }
 0x1e1   : > { %v1789_v39 = vunpack.c.l.b16 %v1775_v38  ;;  %v1790_v40 = vunpack.c.h.b16 %v1775_v38 }
 0x1e2   : > { %v2405_v48 = vpop.eup %2404  ;;  %v2166_v49 = vmul.f32 -1.442695, %v1046_v43  ;;  %v1233_v51 = vadd.f32 %v2403_v34, %v1232_v45 }
 0x1e3   : > { %v2407_v52 = vpop.eup %2406  ;;  %v1117_v53 = vadd.f32 1.0, %v2405_v48  ;;  %v1793_v48 = vpack.c.b16 %v1789_v39, %v1789_v39 }
 0x1e4   : > { %v1245_v56 = vmul.f32 %v2407_v52, %v3063_v35  ;;  %2408 = vpow2.f32 %v2166_v49  ;;  %v1237_v57 = vsel %vm1236_vm9, %v2403_v34, %v1233_v51  ;;  %vm1250_vm13 = vweird.f32 %v2407_v52 }
 0x1e5   : > { %2410 = vrcp.f32 %v1117_v53  ;;  %v1242_v59 = vsel %vm1239_vm10, %v1241_v55, %v1237_v57  ;;  %v1270_v11 = vand.u32 2147483648, %v1117_v53  ;;  %v1268_v14 = vand.u32 2147483647, %v1117_v53  ;;  %vm3083_vm1 = vmor %vm1249_vm14, %vm1250_vm13 }
 0x1e6   : > { %v1367_v60 = vpack.c.bf16 %v1242_v59, %v1227_v58  ;;  %v1246_v61 = vsub.f32 1.0, %v1245_v56  ;;  %vm1264_vm3 = vweird.f32 %v1117_v53  ;;  %v1794_v49 = vpack.c.b16 %v1790_v40, %v1790_v40 }
 0x1e7   : > { %v1047_v62 = vpop.f32.mrf.mxu2  ;;  %v1271_v23 = vor.u32 1.1754944e-38, %v1270_v11  ;;  %vm1269_vm6 = vcmp.eq.f32.partialorder %v1268_v14, 8.507059e+37  ;;  %v1822_v54 = vsel %vm1007_vm2, %v1793_v48, 0 }
 0x1e8   : > { %v1048_v63 = vadd.f32 %v3022_v44, %v1047_v62  ;;  %2179 = vmatmul.msk.bf16.vlgmr.msra.gmra.mxu3 %vm1383_vm12, %v1367_v60  ;;  %v1247_v2 = vmul.f32 %v2407_v52, %v1246_v61  ;;  %v1825_v55 = vsel %vm1007_vm2, %v1794_v49, 0 }
 0x1e9   : > { %1833 = vmatpush.bf16.msrb.mxu3 %v1822_v54  ;;  %1882 = vmatpush.bf16.msrb.mxu2 %v1825_v55  ;;  %v2202_v54 = vld [vmem:[%s3412_s7] sm:$0xf]  ;;  %v2253_v55 = vld [vmem:[%s3412_s7 + $0x4] sm:$0xf0] }
 0x1ea   : > { %v2409_v0 = vpop.eup %2408  ;;  %v2167_v1 = vmul.f32 -1.442695, %v1048_v63  ;;  %v1248_v7 = vadd.f32 %v2407_v52, %v1247_v2 }
 0x1eb   : > { %v2411_v3 = vpop.eup %2410  ;;  %v3076_v4 = vadd.f32 1.0, %v2409_v0 }
 0x1ec   : > { %v1260_v5 = vmul.f32 %v2411_v3, %v1117_v53  ;;  %2412 = vpow2.f32 %v2167_v1  ;;  %vm1265_vm15 = vweird.f32 %v2411_v3  ;;  %v1252_v18 = vsel %vm3083_vm1, %v2407_v52, %v1248_v7  ;;  %v3137_v53 = vld [vmem:[%s3411_s6] ss:$0 sm:$0xff] }
 0x1ed   : > { %2414 = vrcp.f32 %v3076_v4  ;;  %vm1266_vm5 = vmor %vm1264_vm3, %vm1265_vm15  ;;  %v1257_v26 = vsel %vm1254_vm4, %v1256_v22, %v1252_v18  ;;  %vm1279_vm7 = vweird.f32 %v3076_v4  ;;  %v1283_v42 = vand.u32 2147483647, %v3076_v4 }
 0x1ee   : > { %v1261_v6 = vsub.f32 1.0, %v1260_v5  ;;  %v1285_v46 = vand.u32 2147483648, %v3076_v4 }
 0x1ef   : > { %v1050_v8 = vpop.f32.mrf.mxu2  ;;  %vm1284_vm14 = vcmp.eq.f32.partialorder %v1283_v42, 8.507059e+37 }
 0x1f0   : > { %v1051_v12 = vadd.f32 %v3022_v44, %v1050_v8  ;;  %v1262_v13 = vmul.f32 %v2411_v3, %v1261_v6  ;;  %v1286_v62 = vor.u32 1.1754944e-38, %v1285_v46 }
 0x1f2   : > { %v2413_v16 = vpop.eup %2412  ;;  %v2168_v17 = vmul.f32 -1.442695, %v1051_v12  ;;  %v1263_v19 = vadd.f32 %v2411_v3, %v1262_v13 }
 0x1f3   : > { %v3089_v20 = vpop.eup %2414  ;;  %v1119_v21 = vadd.f32 1.0, %v2413_v16 }
 0x1f4   : > { %v1275_v24 = vmul.f32 %v3089_v20, %v3076_v4  ;;  %2416 = vpow2.f32 %v2168_v17  ;;  %v1267_v25 = vsel %vm1266_vm5, %v2411_v3, %v1263_v19  ;;  %vm1280_vm8 = vweird.f32 %v3089_v20 }
 0x1f5   : > { %2418 = vrcp.f32 %v1119_v21  ;;  %v1272_v27 = vsel %vm1269_vm6, %v1271_v23, %v1267_v25  ;;  %v1300_v47 = vand.u32 2147483648, %v1119_v21  ;;  %v1298_v52 = vand.u32 2147483647, %v1119_v21  ;;  %vm3110_vm10 = vmor %vm1279_vm7, %vm1280_vm8 }
 0x1f6   : > { %v1368_v28 = vpack.c.bf16 %v1272_v27, %v1257_v26  ;;  %v1276_v29 = vsub.f32 1.0, %v1275_v24  ;;  %vm1294_vm13 = vweird.f32 %v1119_v21 }
 0x1f7   : > { %v1052_v30 = vpop.f32.mrf.mxu2  ;;  %v1301_v63 = vor.u32 1.1754944e-38, %v1300_v47  ;;  %vm1299_vm2 = vcmp.eq.f32.partialorder %v1298_v52, 8.507059e+37 }
 0x1f8   : > { %v1053_v31 = vadd.f32 %v3022_v44, %v1052_v30  ;;  %2180 = vmatmul.msk.bf16.gmra.mxu3 %vm1383_vm12, %v1368_v28  ;;  %v1277_v34 = vmul.f32 %v3089_v20, %v1276_v29 }
 0x1fa   : > { %v2417_v32 = vpop.eup %2416  ;;  %v2169_v33 = vmul.f32 -1.442695, %v1053_v31  ;;  %v1278_v41 = vadd.f32 %v3089_v20, %v1277_v34 }
 0x1fb   : > { %v2419_v35 = vpop.eup %2418  ;;  %v3096_v36 = vadd.f32 1.0, %v2417_v32 }
 0x1fc   : > { %v1290_v37 = vmul.f32 %v2419_v35, %v1119_v21  ;;  %2420 = vpow2.f32 %v2169_v33  ;;  %vm1295_vm9 = vweird.f32 %v2419_v35  ;;  %v1282_v58 = vsel %vm3110_vm10, %v3089_v20, %v1278_v41 }
 0x1fd   : > { %2422 = vrcp.f32 %v3096_v36  ;;  %vm1296_vm15 = vmor %vm1294_vm13, %vm1295_vm9  ;;  %v1287_v2 = vsel %vm1284_vm14, %v1286_v62, %v1282_v58  ;;  %vm1309_vm3 = vweird.f32 %v3096_v36  ;;  %v1315_v16 = vand.u32 2147483648, %v3096_v36 }
 0x1fe   : > { %v1291_v43 = vsub.f32 1.0, %v1290_v37  ;;  %v2203_v58 = vor.u32 %v2253_v55, %v2202_v54 }
 0x1ff   : > { %v1055_v45 = vpop.f32.mrf.mxu2  ;;  %v1316_v26 = vor.u32 1.1754944e-38, %v1315_v16 }
 0x200   : > { %v1056_v50 = vadd.f32 %v3022_v44, %v1055_v45  ;;  %v1292_v51 = vmul.f32 %v2419_v35, %v1291_v43  ;;  %1834 = vmatpush.bf16.msrb.mxu3 %v2203_v58 }
 0x202   : > { %v2421_v56 = vpop.eup %2420  ;;  %v2170_v57 = vmul.f32 -1.442695, %v1056_v50  ;;  %v1293_v59 = vadd.f32 %v2419_v35, %v1292_v51 }
 0x203   : > { %v2423_v60 = vpop.eup %2422  ;;  %v1121_v61 = vadd.f32 1.0, %v2421_v56  ;;  %v2252_v56 = vld [vmem:[%s3412_s7 + $0x4] sm:$0xf] }
 0x204   : > { %v1305_v0 = vmul.f32 %v2423_v60, %v3096_v36  ;;  %2424 = vpow2.f32 %v2170_v57  ;;  %v1297_v1 = vsel %vm1296_vm15, %v2419_v35, %v1293_v59  ;;  %vm1310_vm1 = vweird.f32 %v2423_v60  ;;  %v2204_v59 = vld [vmem:[%s3412_s7 + $0x8] sm:$0xf0] }
 0x205   : > { %2426 = vrcp.f32 %v1121_v61  ;;  %v1302_v3 = vsel %vm1299_vm2, %v1301_v63, %v1297_v1  ;;  %v1330_v17 = vand.u32 2147483648, %v1121_v61  ;;  %v1328_v19 = vand.u32 2147483647, %v1121_v61  ;;  %vm3126_vm5 = vmor %vm1309_vm3, %vm1310_vm1 }
 0x206   : > { %v1369_v4 = vpack.c.bf16 %v1302_v3, %v1287_v2  ;;  %v1306_v5 = vsub.f32 1.0, %v1305_v0  ;;  %vm1324_vm6 = vweird.f32 %v1121_v61 }
 0x207   : > { %v1057_v7 = vpop.f32.mrf.mxu2  ;;  %v1331_v27 = vor.u32 1.1754944e-38, %v1330_v17  ;;  %vm1329_vm9 = vcmp.eq.f32.partialorder %v1328_v19, 8.507059e+37 }
 0x208   : > { %v1058_v6 = vadd.f32 %v3022_v44, %v1057_v7  ;;  %2181 = vmatmul.msk.bf16.gmra.mxu3 %vm1383_vm12, %v1369_v4  ;;  %v1307_v10 = vmul.f32 %v2423_v60, %v1306_v5  ;;  %v1313_v44 = vand.u32 2147483647, %v3096_v36 }
 0x20a   : > { %v2425_v8 = vpop.eup %2424  ;;  %v2171_v9 = vmul.f32 -1.442695, %v1058_v6  ;;  %v1308_v14 = vadd.f32 %v2423_v60, %v1307_v10  ;;  %vm1314_vm8 = vcmp.eq.f32.partialorder %v1313_v44, 8.507059e+37 }
 0x20b   : > { %v2427_v11 = vpop.eup %2426  ;;  %v1122_v12 = vadd.f32 1.0, %v2425_v8 }
 0x20c   : > { %v1320_v13 = vmul.f32 %v2427_v11, %v1121_v61  ;;  %2428 = vpow2.f32 %v2171_v9  ;;  %vm1325_vm4 = vweird.f32 %v2427_v11  ;;  %v1312_v22 = vsel %vm3126_vm5, %v2423_v60, %v1308_v14 }
 0x20d   : > { %2430 = vrcp.f32 %v1122_v12  ;;  %vm1326_vm7 = vmor %vm1324_vm6, %vm1325_vm4  ;;  %v1317_v30 = vsel %vm1314_vm8, %v1316_v26, %v1312_v22  ;;  %vm1339_vm13 = vweird.f32 %v1122_v12  ;;  %v1345_v39 = vand.u32 2147483648, %v1122_v12 }
 0x20e   : > { %v1321_v15 = vsub.f32 1.0, %v1320_v13  ;;  %v1343_v41 = vand.u32 2147483647, %v1122_v12  ;;  %v2207_v61 = vor.u32 %v2252_v56, %v2204_v59 }
 0x20f   : > { %v1346_v47 = vor.u32 1.1754944e-38, %v1345_v39 }
 0x210   : > { %v1322_v18 = vmul.f32 %v2427_v11, %v1321_v15  ;;  %vm1344_vm3 = vcmp.eq.f32.partialorder %v1343_v41, 8.507059e+37  ;;  %1883 = vmatpush.bf16.msrb.mxu2 %v2207_v61 }
 0x212   : > { %v2429_v21 = vpop.eup %2428  ;;  %v1323_v23 = vadd.f32 %v2427_v11, %v1322_v18 }
 0x213   : > { %v2431_v24 = vpop.eup %2430  ;;  %v1123_v25 = vadd.f32 1.0, %v2429_v21 }
 0x214   : > { %v1335_v28 = vmul.f32 %v2431_v24, %v1122_v12  ;;  %v1327_v29 = vsel %vm1326_vm7, %v2427_v11, %v1323_v23  ;;  %vm1340_vm10 = vweird.f32 %v2431_v24 }
 0x215   : > { %2432 = vrcp.f32 %v1123_v25  ;;  %v1332_v31 = vsel %vm1329_vm9, %v1331_v27, %v1327_v29  ;;  %v1360_v40 = vand.u32 2147483648, %v1123_v25  ;;  %v1358_v43 = vand.u32 2147483647, %v1123_v25  ;;  %vm1341_vm15 = vmor %vm1339_vm13, %vm1340_vm10 }
 0x216   : > { %v1370_v32 = vpack.c.bf16 %v1332_v31, %v1317_v30  ;;  %v1336_v33 = vsub.f32 1.0, %v1335_v28  ;;  %vm1354_vm2 = vweird.f32 %v1123_v25 }
 0x217   : > { %v1361_v48 = vor.u32 1.1754944e-38, %v1360_v40  ;;  %vm1359_vm4 = vcmp.eq.f32.partialorder %v1358_v43, 8.507059e+37 }
 0x218   : > { %2182 = vmatmul.msk.bf16.gmra.mxu3 %vm1383_vm12, %v1370_v32  ;;  %v1337_v34 = vmul.f32 %v2431_v24, %v1336_v33 }
 0x21a   : > { %v1338_v37 = vadd.f32 %v2431_v24, %v1337_v34 }
 0x21b   : > { %v2433_v35 = vpop.eup %2432 }
 0x21c   : > { %v1350_v36 = vmul.f32 %v2433_v35, %v1123_v25  ;;  %vm1355_vm14 = vweird.f32 %v2433_v35  ;;  %v1342_v45 = vsel %vm1341_vm15, %v2431_v24, %v1338_v37 }
 0x21d   : > { %vm1356_vm1 = vmor %vm1354_vm2, %vm1355_vm14  ;;  %v1347_v50 = vsel %vm1344_vm3, %v1346_v47, %v1342_v45 }
 0x21e   : > { %v1351_v38 = vsub.f32 1.0, %v1350_v36 }
 0x220   : > { %v1352_v42 = vmul.f32 %v2433_v35, %v1351_v38 }
 0x222   : > { %v1353_v46 = vadd.f32 %v2433_v35, %v1352_v42 }
 0x224   : > { %v1357_v49 = vsel %vm1356_vm1, %v2433_v35, %v1353_v46 }
 0x225   : > { %v1362_v51 = vsel %vm1359_vm4, %v1361_v48, %v1357_v49 }
 0x226   : > { %v1371_v52 = vpack.c.bf16 %v1362_v51, %v1347_v50 }
 0x228   : > { %2183 = vmatmul.msk.bf16.gmra.mxu3 %vm1383_vm12, %v1371_v52 }
 0x22f   : > { %v1421_v57 = vpop.f32.mrf.mxu0 }
 0x230   : > { %v1422_v60 = vadd.f32 %v3137_v53, %v1421_v57 }
 0x232   : > { %v2184_v62 = vmul.f32 -1.442695, %v1422_v60 }
 0x234   : > { %2434 = vpow2.f32 %v2184_v62 }
 0x237   : > { %v1423_v63 = vpop.f32.mrf.mxu0 }
 0x238   : > { %v1424_v0 = vadd.f32 %v3137_v53, %v1423_v63 }
 0x23a   : > { %v2435_v1 = vpop.eup %2434  ;;  %v2185_v2 = vmul.f32 -1.442695, %v1424_v0 }
 0x23b   : > { %v1509_v3 = vadd.f32 1.0, %v2435_v1 }
 0x23c   : > { %2436 = vpow2.f32 %v2185_v2 }
 0x23d   : > { %2438 = vrcp.f32 %v1509_v3  ;;  %vm1530_vm5 = vweird.f32 %v1509_v3  ;;  %v1534_v22 = vand.u32 2147483647, %v1509_v3  ;;  %v1536_v23 = vand.u32 2147483648, %v1509_v3 }
 0x23f   : > { %v1426_v4 = vpop.f32.mrf.mxu0  ;;  %vm1535_vm9 = vcmp.eq.f32.partialorder %v1534_v22, 8.507059e+37  ;;  %v1537_v35 = vor.u32 1.1754944e-38, %v1536_v23 }
 0x240   : > { %v1427_v5 = vadd.f32 %v3137_v53, %v1426_v4 }
 0x242   : > { %v2437_v7 = vpop.eup %2436  ;;  %v2186_v6 = vmul.f32 -1.442695, %v1427_v5 }
 0x243   : > { %v2439_v8 = vpop.eup %2438  ;;  %v1510_v9 = vadd.f32 1.0, %v2437_v7 }
 0x244   : > { %v1526_v10 = vmul.f32 %v2439_v8, %v1509_v3  ;;  %2440 = vpow2.f32 %v2186_v6  ;;  %vm1531_vm12 = vweird.f32 %v2439_v8 }
 0x245   : > { %2442 = vrcp.f32 %v1510_v9  ;;  %v1551_v24 = vand.u32 2147483648, %v1510_v9  ;;  %v1549_v27 = vand.u32 2147483647, %v1510_v9  ;;  %vm3159_vm7 = vmor %vm1530_vm5, %vm1531_vm12  ;;  %vm1545_vm8 = vweird.f32 %v1510_v9 }
 0x246   : > { %v1527_v11 = vsub.f32 1.0, %v1526_v10 }
 0x247   : > { %v1428_v12 = vpop.f32.mrf.mxu0  ;;  %v1552_v36 = vor.u32 1.1754944e-38, %v1551_v24  ;;  %vm1550_vm13 = vcmp.eq.f32.partialorder %v1549_v27, 8.507059e+37 }
 0x248   : > { %v1429_v13 = vadd.f32 %v3137_v53, %v1428_v12  ;;  %v1528_v16 = vmul.f32 %v2439_v8, %v1527_v11 }
 0x24a   : > { %v2441_v14 = vpop.eup %2440  ;;  %v2187_v15 = vmul.f32 -1.442695, %v1429_v13  ;;  %v1529_v20 = vadd.f32 %v2439_v8, %v1528_v16 }
 0x24b   : > { %v2443_v17 = vpop.eup %2442  ;;  %v3155_v44 = vadd.f32 1.0, %v2441_v14 }
 0x24c   : > { %v1541_v18 = vmul.f32 %v2443_v17, %v1510_v9  ;;  %2444 = vpow2.f32 %v2187_v15  ;;  %vm1546_vm6 = vweird.f32 %v2443_v17  ;;  %v1533_v31 = vsel %vm3159_vm7, %v2439_v8, %v1529_v20 }
 0x24d   : > { %2446 = vrcp.f32 %v3155_v44  ;;  %vm1547_vm10 = vmor %vm1545_vm8, %vm1546_vm6  ;;  %v1538_v39 = vsel %vm1535_vm9, %v1537_v35, %v1533_v31  ;;  %vm1560_vm15 = vweird.f32 %v3155_v44  ;;  %v1566_v55 = vand.u32 2147483648, %v3155_v44 }
 0x24e   : > { %v1542_v19 = vsub.f32 1.0, %v1541_v18  ;;  %v1564_v57 = vand.u32 2147483647, %v3155_v44 }
 0x24f   : > { %v1431_v21 = vpop.f32.mrf.mxu0  ;;  %v1567_v2 = vor.u32 1.1754944e-38, %v1566_v55 }
 0x250   : > { %v1432_v25 = vadd.f32 %v3137_v53, %v1431_v21  ;;  %v1543_v26 = vmul.f32 %v2443_v17, %v1542_v19  ;;  %vm1565_vm12 = vcmp.eq.f32.partialorder %v1564_v57, 8.507059e+37 }
 0x252   : > { %v2445_v29 = vpop.eup %2444  ;;  %v2188_v30 = vmul.f32 -1.442695, %v1432_v25  ;;  %v1544_v32 = vadd.f32 %v2443_v17, %v1543_v26 }
 0x253   : > { %v2447_v33 = vpop.eup %2446  ;;  %v1512_v34 = vadd.f32 1.0, %v2445_v29 }
 0x254   : > { %v1556_v37 = vmul.f32 %v2447_v33, %v3155_v44  ;;  %2448 = vpow2.f32 %v2188_v30  ;;  %v1548_v38 = vsel %vm1547_vm10, %v2443_v17, %v1544_v32  ;;  %vm1561_vm14 = vweird.f32 %v2447_v33 }
 0x255   : > { %2450 = vrcp.f32 %v1512_v34  ;;  %v1553_v40 = vsel %vm1550_vm13, %v1552_v36, %v1548_v38  ;;  %v1581_v56 = vand.u32 2147483648, %v1512_v34  ;;  %v1579_v59 = vand.u32 2147483647, %v1512_v34  ;;  %vm3172_vm1 = vmor %vm1560_vm15, %vm1561_vm14 }
 0x256   : > { %v1765_v41 = vpack.c.bf16 %v1553_v40, %v1538_v39  ;;  %v1557_v42 = vsub.f32 1.0, %v1556_v37  ;;  %vm1575_vm3 = vweird.f32 %v1512_v34 }
 0x257   : > { %v1433_v43 = vpop.f32.mrf.mxu0  ;;  %v1582_v3 = vor.u32 1.1754944e-38, %v1581_v56  ;;  %vm1580_vm5 = vcmp.eq.f32.partialorder %v1579_v59, 8.507059e+37 }
 0x258   : > { %v1434_v45 = vadd.f32 %v3137_v53, %v1433_v43  ;;  %2208 = vmatmul.msk.bf16.vlgmr.msrb.gmra.mxu3 %vm982_vm11, %v1765_v41  ;;  %2216 = vmatmul.msk.bf16.vlgmr.msrb.gmra.mxu2 %vm982_vm11, %v1765_v41  ;;  %v1558_v48 = vmul.f32 %v2447_v33, %v1557_v42 }
 0x25a   : > { %v2449_v46 = vpop.eup %2448  ;;  %v2189_v47 = vmul.f32 -1.442695, %v1434_v45  ;;  %v1559_v52 = vadd.f32 %v2447_v33, %v1558_v48 }
 0x25b   : > { %v2451_v49 = vpop.eup %2450  ;;  %v1513_v50 = vadd.f32 1.0, %v2449_v46 }
 0x25c   : > { %v1571_v51 = vmul.f32 %v2451_v49, %v1512_v34  ;;  %2452 = vpow2.f32 %v2189_v47  ;;  %vm1576_vm2 = vweird.f32 %v2451_v49  ;;  %v1563_v62 = vsel %vm3172_vm1, %v2447_v33, %v1559_v52 }
 0x25d   : > { %2454 = vrcp.f32 %v1513_v50  ;;  %vm1577_vm4 = vmor %vm1575_vm3, %vm1576_vm2  ;;  %v1568_v7 = vsel %vm1565_vm12, %v1567_v2, %v1563_v62  ;;  %vm1590_vm7 = vweird.f32 %v1513_v50  ;;  %v1594_v44 = vand.u32 2147483647, %v1513_v50 }
 0x25e   : > { %v1572_v54 = vsub.f32 1.0, %v1571_v51  ;;  %v1596_v18 = vand.u32 2147483648, %v1513_v50 }
 0x25f   : > { %vm1595_vm14 = vcmp.eq.f32.partialorder %v1594_v44, 8.507059e+37 }
 0x260   : > { %v1573_v58 = vmul.f32 %v2451_v49, %v1572_v54  ;;  %v1597_v25 = vor.u32 1.1754944e-38, %v1596_v18 }
 0x262   : > { %v2453_v61 = vpop.eup %2452  ;;  %v1574_v63 = vadd.f32 %v2451_v49, %v1573_v58 }
 0x263   : > { %v2455_v0 = vpop.eup %2454  ;;  %v1514_v1 = vadd.f32 1.0, %v2453_v61 }
 0x264   : > { %v1586_v4 = vmul.f32 %v2455_v0, %v1513_v50  ;;  %v1578_v5 = vsel %vm1577_vm4, %v2451_v49, %v1574_v63  ;;  %vm1591_vm6 = vweird.f32 %v2455_v0 }
 0x265   : > { %2456 = vrcp.f32 %v1514_v1  ;;  %v1583_v6 = vsel %vm1580_vm5, %v1582_v3, %v1578_v5  ;;  %v1611_v19 = vand.u32 2147483648, %v1514_v1  ;;  %v1609_v21 = vand.u32 2147483647, %v1514_v1  ;;  %vm1592_vm9 = vmor %vm1590_vm7, %vm1591_vm6 }
 0x266   : > { %v1766_v8 = vpack.c.bf16 %v1583_v6, %v1568_v7  ;;  %v1587_v9 = vsub.f32 1.0, %v1586_v4  ;;  %vm1605_vm10 = vweird.f32 %v1514_v1 }
 0x267   : > { %v1612_v26 = vor.u32 1.1754944e-38, %v1611_v19  ;;  %vm1610_vm15 = vcmp.eq.f32.partialorder %v1609_v21, 8.507059e+37 }
 0x268   : > { %2209 = vmatmul.msk.bf16.gmra.mxu3 %vm982_vm11, %v1766_v8  ;;  %2217 = vmatmul.msk.bf16.gmra.mxu2 %vm982_vm11, %v1766_v8  ;;  %v1588_v10 = vmul.f32 %v2455_v0, %v1587_v9 }
 0x26a   : > { %v1589_v16 = vadd.f32 %v2455_v0, %v1588_v10 }
 0x26b   : > { %v2457_v11 = vpop.eup %2456  ;;  %v1436_v12 = vpop.f32.mrf.mxu3 }
 0x26c   : > { %v1601_v13 = vmul.f32 %v2457_v11, %v1514_v1  ;;  %v1437_v14 = vadd.f32 %v3137_v53, %v1436_v12  ;;  %vm1606_vm8 = vweird.f32 %v2457_v11  ;;  %v1593_v22 = vsel %vm1592_vm9, %v2455_v0, %v1589_v16 }
 0x26d   : > { %vm1607_vm13 = vmor %vm1605_vm10, %vm1606_vm8  ;;  %v1598_v29 = vsel %vm1595_vm14, %v1597_v25, %v1593_v22 }
 0x26e   : > { %v2190_v15 = vmul.f32 -1.442695, %v1437_v14  ;;  %v1602_v17 = vsub.f32 1.0, %v1601_v13 }
 0x270   : > { %2458 = vpow2.f32 %v2190_v15  ;;  %v1603_v20 = vmul.f32 %v2457_v11, %v1602_v17 }
 0x272   : > { %v1604_v23 = vadd.f32 %v2457_v11, %v1603_v20 }
 0x273   : > { %v1438_v24 = vpop.f32.mrf.mxu3 }
 0x274   : > { %v1439_v27 = vadd.f32 %v3137_v53, %v1438_v24  ;;  %v1608_v28 = vsel %vm1607_vm13, %v2457_v11, %v1604_v23 }
 0x275   : > { %v1613_v30 = vsel %vm1610_vm15, %v1612_v26, %v1608_v28 }
 0x276   : > { %v2459_v31 = vpop.eup %2458  ;;  %v2191_v32 = vmul.f32 -1.442695, %v1439_v27  ;;  %v1767_v33 = vpack.c.bf16 %v1613_v30, %v1598_v29 }
 0x277   : > { %v1515_v34 = vadd.f32 1.0, %v2459_v31 }
 0x278   : > { %2460 = vpow2.f32 %v2191_v32  ;;  %2210 = vmatmul.msk.bf16.gmra.mxu3 %vm982_vm11, %v1767_v33  ;;  %2218 = vmatmul.msk.bf16.gmra.mxu2 %vm982_vm11, %v1767_v33 }
 0x279   : > { %2462 = vrcp.f32 %v1515_v34  ;;  %vm1620_vm1 = vweird.f32 %v1515_v34  ;;  %v1624_v56 = vand.u32 2147483647, %v1515_v34  ;;  %v1626_v57 = vand.u32 2147483648, %v1515_v34 }
 0x27b   : > { %v1441_v35 = vpop.f32.mrf.mxu3  ;;  %vm1625_vm5 = vcmp.eq.f32.partialorder %v1624_v56, 8.507059e+37  ;;  %v1627_v5 = vor.u32 1.1754944e-38, %v1626_v57 }
 0x27c   : > { %v1442_v36 = vadd.f32 %v3137_v53, %v1441_v35 }
 0x27e   : > { %v2461_v37 = vpop.eup %2460  ;;  %v2192_v38 = vmul.f32 -1.442695, %v1442_v36 }
 0x27f   : > { %v2463_v39 = vpop.eup %2462  ;;  %v1516_v40 = vadd.f32 1.0, %v2461_v37 }
 0x280   : > { %v1616_v41 = vmul.f32 %v2463_v39, %v1515_v34  ;;  %2464 = vpow2.f32 %v2192_v38  ;;  %vm1621_vm2 = vweird.f32 %v2463_v39 }
 0x281   : > { %2466 = vrcp.f32 %v1516_v40  ;;  %v1641_v58 = vand.u32 2147483648, %v1516_v40  ;;  %v1639_v61 = vand.u32 2147483647, %v1516_v40  ;;  %vm3190_vm4 = vmor %vm1620_vm1, %vm1621_vm2  ;;  %vm1635_vm12 = vweird.f32 %v1516_v40 }
 0x282   : > { %v1617_v42 = vsub.f32 1.0, %v1616_v41 }
 0x283   : > { %v1443_v43 = vpop.f32.mrf.mxu3  ;;  %v1642_v7 = vor.u32 1.1754944e-38, %v1641_v58  ;;  %vm1640_vm7 = vcmp.eq.f32.partialorder %v1639_v61, 8.507059e+37 }
 0x284   : > { %v1444_v45 = vadd.f32 %v3137_v53, %v1443_v43  ;;  %v1618_v48 = vmul.f32 %v2463_v39, %v1617_v42 }
 0x286   : > { %v2465_v46 = vpop.eup %2464  ;;  %v2193_v47 = vmul.f32 -1.442695, %v1444_v45  ;;  %v1619_v52 = vadd.f32 %v2463_v39, %v1618_v48 }
 0x287   : > { %v2467_v49 = vpop.eup %2466  ;;  %v3186_v50 = vadd.f32 1.0, %v2465_v46 }
 0x288   : > { %2468 = vpow2.f32 %v2193_v47  ;;  %v1631_v51 = vmul.f32 %v2467_v49, %v1516_v40  ;;  %vm1636_vm3 = vweird.f32 %v2467_v49  ;;  %v1623_v1 = vsel %vm3190_vm4, %v2463_v39, %v1619_v52 }
 0x289   : > { %2470 = vrcp.f32 %v3186_v50  ;;  %vm1637_vm6 = vmor %vm1635_vm12, %vm1636_vm3  ;;  %v1628_v9 = vsel %vm1625_vm5, %v1627_v5, %v1623_v1  ;;  %vm1650_vm9 = vweird.f32 %v3186_v50  ;;  %v1654_v23 = vand.u32 2147483647, %v3186_v50 }
 0x28a   : > { %v1632_v54 = vsub.f32 1.0, %v1631_v51  ;;  %v1656_v24 = vand.u32 2147483648, %v3186_v50 }
 0x28b   : > { %v1446_v55 = vpop.f32.mrf.mxu3  ;;  %vm1655_vm15 = vcmp.eq.f32.partialorder %v1654_v23, 8.507059e+37 }
 0x28c   : > { %v1447_v59 = vadd.f32 %v3137_v53, %v1446_v55  ;;  %v1633_v60 = vmul.f32 %v2467_v49, %v1632_v54  ;;  %v1657_v36 = vor.u32 1.1754944e-38, %v1656_v24 }
 0x28e   : > { %v2469_v63 = vpop.eup %2468  ;;  %v2194_v0 = vmul.f32 -1.442695, %v1447_v59  ;;  %v1634_v2 = vadd.f32 %v2467_v49, %v1633_v60 }
 0x28f   : > { %v2471_v3 = vpop.eup %2470  ;;  %v1518_v4 = vadd.f32 1.0, %v2469_v63 }
 0x290   : > { %v1646_v6 = vmul.f32 %v2471_v3, %v3186_v50  ;;  %2472 = vpow2.f32 %v2194_v0  ;;  %v1638_v8 = vsel %vm1637_vm6, %v2467_v49, %v1634_v2  ;;  %vm1651_vm8 = vweird.f32 %v2471_v3 }
 0x291   : > { %2474 = vrcp.f32 %v1518_v4  ;;  %v1643_v10 = vsel %vm1640_vm7, %v1642_v7, %v1638_v8  ;;  %v1671_v25 = vand.u32 2147483648, %v1518_v4  ;;  %v1669_v28 = vand.u32 2147483647, %v1518_v4  ;;  %vm3207_vm13 = vmor %vm1650_vm9, %vm1651_vm8 }
 0x292   : > { %v1768_v11 = vpack.c.bf16 %v1643_v10, %v1628_v9  ;;  %v1647_v12 = vsub.f32 1.0, %v1646_v6  ;;  %vm1665_vm14 = vweird.f32 %v1518_v4 }
 0x293   : > { %v1448_v13 = vpop.f32.mrf.mxu3  ;;  %v1672_v37 = vor.u32 1.1754944e-38, %v1671_v25  ;;  %vm1670_vm1 = vcmp.eq.f32.partialorder %v1669_v28, 8.507059e+37 }
 0x294   : > { %v1449_v14 = vadd.f32 %v3137_v53, %v1448_v13  ;;  %2211 = vmatmul.msk.bf16.gmra.mxu3 %vm982_vm11, %v1768_v11  ;;  %2219 = vmatmul.msk.bf16.gmra.mxu2 %vm982_vm11, %v1768_v11  ;;  %v1648_v17 = vmul.f32 %v2471_v3, %v1647_v12 }
 0x296   : > { %v2473_v15 = vpop.eup %2472  ;;  %v2195_v16 = vmul.f32 -1.442695, %v1449_v14  ;;  %v1649_v20 = vadd.f32 %v2471_v3, %v1648_v17 }
 0x297   : > { %v2475_v44 = vpop.eup %2474  ;;  %v3200_v18 = vadd.f32 1.0, %v2473_v15 }
 0x298   : > { %v1661_v19 = vmul.f32 %v2475_v44, %v1518_v4  ;;  %2476 = vpow2.f32 %v2195_v16  ;;  %vm1666_vm10 = vweird.f32 %v2475_v44  ;;  %v1653_v32 = vsel %vm3207_vm13, %v2471_v3, %v1649_v20 }
 0x299   : > { %2478 = vrcp.f32 %v3200_v18  ;;  %vm1667_vm2 = vmor %vm1665_vm14, %vm1666_vm10  ;;  %v1658_v40 = vsel %vm1655_vm15, %v1657_v36, %v1653_v32  ;;  %vm1680_vm4 = vweird.f32 %v3200_v18  ;;  %v1684_v57 = vand.u32 2147483647, %v3200_v18 }
 0x29a   : > { %v1662_v21 = vsub.f32 1.0, %v1661_v19  ;;  %v1686_v58 = vand.u32 2147483648, %v3200_v18 }
 0x29b   : > { %v1451_v22 = vpop.f32.mrf.mxu3  ;;  %vm1685_vm7 = vcmp.eq.f32.partialorder %v1684_v57, 8.507059e+37 }
 0x29c   : > { %v1452_v26 = vadd.f32 %v3137_v53, %v1451_v22  ;;  %v1663_v27 = vmul.f32 %v2475_v44, %v1662_v21  ;;  %v1687_v7 = vor.u32 1.1754944e-38, %v1686_v58 }
 0x29e   : > { %v2477_v30 = vpop.eup %2476  ;;  %v2196_v31 = vmul.f32 -1.442695, %v1452_v26  ;;  %v1664_v33 = vadd.f32 %v2475_v44, %v1663_v27 }
 0x29f   : > { %v2479_v34 = vpop.eup %2478  ;;  %v1520_v35 = vadd.f32 1.0, %v2477_v30 }
 0x2a0   : > { %v1676_v38 = vmul.f32 %v2479_v34, %v3200_v18  ;;  %2480 = vpow2.f32 %v2196_v31  ;;  %v1668_v39 = vsel %vm1667_vm2, %v2475_v44, %v1664_v33  ;;  %vm1681_vm3 = vweird.f32 %v2479_v34 }
 0x2a1   : > { %2482 = vrcp.f32 %v1520_v35  ;;  %v1673_v41 = vsel %vm1670_vm1, %v1672_v37, %v1668_v39  ;;  %v1701_v59 = vand.u32 2147483648, %v1520_v35  ;;  %v1699_v62 = vand.u32 2147483647, %v1520_v35  ;;  %vm3224_vm5 = vmor %vm1680_vm4, %vm1681_vm3 }
 0x2a2   : > { %v1769_v42 = vpack.c.bf16 %v1673_v41, %v1658_v40  ;;  %v1677_v43 = vsub.f32 1.0, %v1676_v38  ;;  %vm1695_vm6 = vweird.f32 %v1520_v35 }
 0x2a3   : > { %v1453_v45 = vpop.f32.mrf.mxu3  ;;  %v1702_v6 = vor.u32 1.1754944e-38, %v1701_v59  ;;  %vm1700_vm9 = vcmp.eq.f32.partialorder %v1699_v62, 8.507059e+37 }
 0x2a4   : > { %v1454_v46 = vadd.f32 %v3137_v53, %v1453_v45  ;;  %2212 = vmatmul.msk.bf16.gmra.mxu3 %vm982_vm11, %v1769_v42  ;;  %2220 = vmatmul.msk.bf16.gmra.mxu2 %vm982_vm11, %v1769_v42  ;;  %v1678_v49 = vmul.f32 %v2479_v34, %v1677_v43 }
 0x2a6   : > { %v2481_v47 = vpop.eup %2480  ;;  %v2197_v48 = vmul.f32 -1.442695, %v1454_v46  ;;  %v1679_v54 = vadd.f32 %v2479_v34, %v1678_v49 }
 0x2a7   : > { %v2483_v50 = vpop.eup %2482  ;;  %v3217_v51 = vadd.f32 1.0, %v2481_v47 }
 0x2a8   : > { %v1691_v52 = vmul.f32 %v2483_v50, %v1520_v35  ;;  %2484 = vpow2.f32 %v2197_v48  ;;  %vm1696_vm12 = vweird.f32 %v2483_v50  ;;  %v1683_v2 = vsel %vm3224_vm5, %v2479_v34, %v1679_v54 }
 0x2a9   : > { %2486 = vrcp.f32 %v3217_v51  ;;  %vm1697_vm8 = vmor %vm1695_vm6, %vm1696_vm12  ;;  %v1688_v10 = vsel %vm1685_vm7, %v1687_v7, %v1683_v2  ;;  %vm1710_vm13 = vweird.f32 %v3217_v51  ;;  %v1716_v23 = vand.u32 2147483648, %v3217_v51 }
 0x2aa   : > { %v1692_v55 = vsub.f32 1.0, %v1691_v52  ;;  %v1714_v24 = vand.u32 2147483647, %v3217_v51 }
 0x2ab   : > { %v1456_v56 = vpop.f32.mrf.mxu3  ;;  %v1717_v33 = vor.u32 1.1754944e-38, %v1716_v23 }
 0x2ac   : > { %v1457_v60 = vadd.f32 %v3137_v53, %v1456_v56  ;;  %v1693_v61 = vmul.f32 %v2483_v50, %v1692_v55  ;;  %vm1715_vm3 = vcmp.eq.f32.partialorder %v1714_v24, 8.507059e+37 }
 0x2ae   : > { %v2485_v0 = vpop.eup %2484  ;;  %v2198_v1 = vmul.f32 -1.442695, %v1457_v60  ;;  %v1694_v3 = vadd.f32 %v2483_v50, %v1693_v61  ;;  %v1776_v61 = vld [vmem:[%s3413_s8] sm:$0x3] }
 0x2af   : > { %v2487_v4 = vpop.eup %2486  ;;  %v1522_v5 = vadd.f32 1.0, %v2485_v0  ;;  %v3250_v62 = vperm.slane %v1776_v61, 0  ;;  %v3252_v63 = vperm.slane %v1776_v61, 1 }
 0x2b0   : > { %v1706_v8 = vmul.f32 %v2487_v4, %v3217_v51  ;;  %2488 = vpow2.f32 %v2198_v1  ;;  %v1698_v9 = vsel %vm1697_vm8, %v2483_v50, %v1694_v3  ;;  %vm1711_vm10 = vweird.f32 %v2487_v4 }
 0x2b1   : > { %2490 = vrcp.f32 %v1522_v5  ;;  %v1703_v11 = vsel %vm1700_vm9, %v1702_v6, %v1698_v9  ;;  %v1729_v26 = vand.u32 2147483647, %v1522_v5  ;;  %vm3237_vm15 = vmor %vm1710_vm13, %vm1711_vm10  ;;  %vm1725_vm2 = vweird.f32 %v1522_v5 }
 0x2b2   : > { %v1770_v12 = vpack.c.bf16 %v1703_v11, %v1688_v10  ;;  %v1707_v13 = vsub.f32 1.0, %v1706_v8 }
 0x2b3   : > { %v1458_v14 = vpop.f32.mrf.mxu3  ;;  %vm1730_vm4 = vcmp.eq.f32.partialorder %v1729_v26, 8.507059e+37 }
 0x2b4   : > { %v1459_v15 = vadd.f32 %v3137_v53, %v1458_v14  ;;  %2213 = vmatmul.msk.bf16.gmra.mxu3 %vm982_vm11, %v1770_v12  ;;  %2221 = vmatmul.msk.bf16.gmra.mxu2 %vm982_vm11, %v1770_v12  ;;  %v1708_v44 = vmul.f32 %v2487_v4, %v1707_v13  ;;  %v1731_v53 = vand.u32 2147483648, %v1522_v5 }
 0x2b6   : > { %v2489_v16 = vpop.eup %2488  ;;  %v2199_v17 = vmul.f32 -1.442695, %v1459_v15  ;;  %v1709_v21 = vadd.f32 %v2487_v4, %v1708_v44  ;;  %v1732_v34 = vor.u32 1.1754944e-38, %v1731_v53 }
 0x2b7   : > { %v2491_v18 = vpop.eup %2490  ;;  %v1523_v19 = vadd.f32 1.0, %v2489_v16 }
 0x2b8   : > { %v1721_v20 = vmul.f32 %v2491_v18, %v1522_v5  ;;  %2492 = vpow2.f32 %v2199_v17  ;;  %vm1726_vm14 = vweird.f32 %v2491_v18  ;;  %v1713_v29 = vsel %vm3237_vm15, %v2487_v4, %v1709_v21 }
 0x2b9   : > { %2494 = vrcp.f32 %v1523_v19  ;;  %vm1727_vm1 = vmor %vm1725_vm2, %vm1726_vm14  ;;  %v1718_v37 = vsel %vm1715_vm3, %v1717_v33, %v1713_v29  ;;  %vm1740_vm5 = vweird.f32 %v1523_v19  ;;  %v1746_v47 = vand.u32 2147483648, %v1523_v19 }
 0x2ba   : > { %v1722_v22 = vsub.f32 1.0, %v1721_v20  ;;  %v1744_v49 = vand.u32 2147483647, %v1523_v19  ;;  %vm1941_vm14 = vcmask 588804  }
 0x2bb   : > { %v1747_v55 = vor.u32 1.1754944e-38, %v1746_v47  ;;  %vm3258_vm15 = vmor %vm1941_vm14, %vm552_vm0 }
 0x2bc   : > { %v1723_v25 = vmul.f32 %v2491_v18, %v1722_v22  ;;  %vm1745_vm10 = vcmp.eq.f32.partialorder %v1744_v49, 8.507059e+37 }
 0x2be   : > { %v2493_v28 = vpop.eup %2492  ;;  %v1724_v30 = vadd.f32 %v2491_v18, %v1723_v25 }
 0x2bf   : > { %v2495_v31 = vpop.eup %2494  ;;  %v1524_v32 = vadd.f32 1.0, %v2493_v28 }
 0x2c0   : > { %v1736_v35 = vmul.f32 %v2495_v31, %v1523_v19  ;;  %v1728_v36 = vsel %vm1727_vm1, %v2491_v18, %v1724_v30  ;;  %vm1741_vm12 = vweird.f32 %v2495_v31 }
 0x2c1   : > { %2496 = vrcp.f32 %v1524_v32  ;;  %v1733_v38 = vsel %vm1730_vm4, %v1732_v34, %v1728_v36  ;;  %v1761_v48 = vand.u32 2147483648, %v1524_v32  ;;  %v1759_v51 = vand.u32 2147483647, %v1524_v32  ;;  %vm1742_vm7 = vmor %vm1740_vm5, %vm1741_vm12 }
 0x2c2   : > { %v1737_v39 = vsub.f32 1.0, %v1736_v35  ;;  %v1771_v40 = vpack.c.bf16 %v1733_v38, %v1718_v37  ;;  %vm1755_vm8 = vweird.f32 %v1524_v32 }
 0x2c3   : > { %v1762_v56 = vor.u32 1.1754944e-38, %v1761_v48  ;;  %vm1760_vm13 = vcmp.eq.f32.partialorder %v1759_v51, 8.507059e+37 }
 0x2c4   : > { %2214 = vmatmul.msk.bf16.gmra.mxu3 %vm982_vm11, %v1771_v40  ;;  %2222 = vmatmul.msk.bf16.gmra.mxu2 %vm982_vm11, %v1771_v40  ;;  %v1738_v41 = vmul.f32 %v2495_v31, %v1737_v39 }
 0x2c6   : > { %v1739_v46 = vadd.f32 %v2495_v31, %v1738_v41 }
 0x2c7   : > { %v2497_v42 = vpop.eup %2496 }
 0x2c8   : > { %v1751_v43 = vmul.f32 %v2497_v42, %v1524_v32  ;;  %vm1756_vm6 = vweird.f32 %v2497_v42  ;;  %v1743_v52 = vsel %vm1742_vm7, %v2495_v31, %v1739_v46 }
 0x2c9   : > { %vm1757_vm9 = vmor %vm1755_vm8, %vm1756_vm6  ;;  %v1748_v58 = vsel %vm1745_vm10, %v1747_v55, %v1743_v52 }
 0x2ca   : > { %v1752_v45 = vsub.f32 1.0, %v1751_v43 }
 0x2cc   : > { %v1753_v50 = vmul.f32 %v2497_v42, %v1752_v45 }
 0x2ce   : > { %v1754_v54 = vadd.f32 %v2497_v42, %v1753_v50 }
 0x2d0   : > { %v1758_v57 = vsel %vm1757_vm9, %v2497_v42, %v1754_v54 }
 0x2d1   : > { %v1763_v59 = vsel %vm1760_vm13, %v1762_v56, %v1758_v57 }
 0x2d2   : > { %v1772_v60 = vpack.c.bf16 %v1763_v59, %v1748_v58 }
 0x2d4   : > { %2215 = vmatmul.msk.bf16.gmra.mxu3 %vm982_vm11, %v1772_v60  ;;  %2223 = vmatmul.msk.bf16.gmra.mxu2 %vm982_vm11, %v1772_v60 }
 0x2db   : > { %v1836_v0 = vpop.f32.mrf.mxu3  ;;  %v1885_v1 = vpop.f32.mrf.mxu2 }
 0x2dc   : > { %v1837_v2 = vadd.f32 %v1836_v0, %v3250_v62  ;;  %v1886_v3 = vadd.f32 %v1885_v1, %v3252_v63 }
 0x2de   : > { %v1925_v5 = vpack.c.bf16 %v1886_v3, %v1837_v2 }
 0x2e0   : > { %1943 = vst.msk [vmem:[%s3262_s27] sm:$0xff] %vm3258_vm15, %v1925_v5 }
 0x2e3   : > { %v1838_v7 = vpop.f32.mrf.mxu3  ;;  %v1887_v6 = vpop.f32.mrf.mxu2 }
 0x2e4   : > { %v1839_v8 = vadd.f32 %v1838_v7, %v3250_v62  ;;  %v1888_v9 = vadd.f32 %v1887_v6, %v3252_v63 }
 0x2e6   : > { %v1926_v10 = vpack.c.bf16 %v1888_v9, %v1839_v8 }
 0x2e8   : > { %1944 = vst.msk [vmem:[%s3262_s27 + $0x8] sm:$0xff] %vm3258_vm15, %v1926_v10 }
 0x2eb   : > { %v1841_v11 = vpop.f32.mrf.mxu3  ;;  %v1890_v12 = vpop.f32.mrf.mxu2 }
 0x2ec   : > { %v1842_v13 = vadd.f32 %v1841_v11, %v3250_v62  ;;  %v1891_v14 = vadd.f32 %v1890_v12, %v3252_v63 }
 0x2ee   : > { %v1927_v15 = vpack.c.bf16 %v1891_v14, %v1842_v13 }
 0x2f0   : > { %1945 = vst.msk [vmem:[%s3262_s27 + $0x10] sm:$0xff] %vm3258_vm15, %v1927_v15 }
 0x2f3   : > { %v1843_v16 = vpop.f32.mrf.mxu3  ;;  %v1892_v17 = vpop.f32.mrf.mxu2 }
 0x2f4   : > { %v1844_v44 = vadd.f32 %v1843_v16, %v3250_v62  ;;  %v1893_v18 = vadd.f32 %v1892_v17, %v3252_v63 }
 0x2f6   : > { %v1928_v19 = vpack.c.bf16 %v1893_v18, %v1844_v44 }
 0x2f8   : > { %1946 = vst.msk [vmem:[%s3262_s27 + $0x18] sm:$0xff] %vm3258_vm15, %v1928_v19 }
 0x2fb   : > { %v1846_v20 = vpop.f32.mrf.mxu3  ;;  %v1895_v21 = vpop.f32.mrf.mxu2 }
 0x2fc   : > { %v1847_v22 = vadd.f32 %v1846_v20, %v3250_v62  ;;  %v1896_v23 = vadd.f32 %v1895_v21, %v3252_v63 }
 0x2fe   : > { %v1929_v53 = vpack.c.bf16 %v1896_v23, %v1847_v22 }
 0x300   : > { %1947 = vst.msk [vmem:[%s3262_s27 + $0x20] sm:$0xff] %vm3258_vm15, %v1929_v53 }
 0x303   : > { %v1848_v24 = vpop.f32.mrf.mxu3  ;;  %v1897_v25 = vpop.f32.mrf.mxu2 }
 0x304   : > { %v1849_v26 = vadd.f32 %v1848_v24, %v3250_v62  ;;  %v1898_v27 = vadd.f32 %v1897_v25, %v3252_v63 }
 0x306   : > { %v1930_v28 = vpack.c.bf16 %v1898_v27, %v1849_v26 }
 0x308   : > { %1948 = vst.msk [vmem:[%s3262_s27 + $0x28] sm:$0xff] %vm3258_vm15, %v1930_v28 }
 0x317   : > { %v1851_v29 = vpop.f32.mrf.mxu3  ;;  %v1900_v30 = vpop.f32.mrf.mxu2 }
 0x318   : > { %v1852_v31 = vadd.f32 %v1851_v29, %v3250_v62  ;;  %v1901_v32 = vadd.f32 %v1900_v30, %v3252_v63 }
 0x31a   : > { %v1931_v33 = vpack.c.bf16 %v1901_v32, %v1852_v31 }
 0x31c   : > { %1949 = vst.msk [vmem:[%s3262_s27 + $0x30] sm:$0xff] %vm3258_vm15, %v1931_v33 }
 0x31f   : > { %v1853_v34 = vpop.f32.mrf.mxu3  ;;  %v1902_v35 = vpop.f32.mrf.mxu2 }
 0x320   : > { %v1854_v36 = vadd.f32 %v1853_v34, %v3250_v62  ;;  %v1903_v37 = vadd.f32 %v1902_v35, %v3252_v63 }
 0x322   : > { %v1932_v38 = vpack.c.bf16 %v1903_v37, %v1854_v36 }
 0x324   : > { %1950 = vst.msk [vmem:[%s3262_s27 + $0x38] sm:$0xff] %vm3258_vm15, %v1932_v38 }
 0x327   : > { %v1856_v39 = vpop.f32.mrf.mxu3  ;;  %v1905_v40 = vpop.f32.mrf.mxu2 }
 0x328   : > { %v1857_v41 = vadd.f32 %v1856_v39, %v3250_v62  ;;  %v1906_v42 = vadd.f32 %v1905_v40, %v3252_v63 }
 0x32a   : > { %v1933_v43 = vpack.c.bf16 %v1906_v42, %v1857_v41 }
 0x32c   : > { %1951 = vst.msk [vmem:[%s3262_s27 + $0x40] sm:$0xff] %vm3258_vm15, %v1933_v43 }
 0x32f   : > { %v1858_v45 = vpop.f32.mrf.mxu3  ;;  %v1907_v46 = vpop.f32.mrf.mxu2 }
 0x330   : > { %v1859_v47 = vadd.f32 %v1858_v45, %v3250_v62  ;;  %v1908_v48 = vadd.f32 %v1907_v46, %v3252_v63 }
 0x332   : > { %v1934_v49 = vpack.c.bf16 %v1908_v48, %v1859_v47 }
 0x334   : > { %1952 = vst.msk [vmem:[%s3262_s27 + $0x48] sm:$0xff] %vm3258_vm15, %v1934_v49 }
 0x337   : > { %v1861_v50 = vpop.f32.mrf.mxu3  ;;  %v1910_v51 = vpop.f32.mrf.mxu2 }
 0x338   : > { %v1862_v52 = vadd.f32 %v1861_v50, %v3250_v62  ;;  %v1911_v54 = vadd.f32 %v1910_v51, %v3252_v63 }
 0x33a   : > { %v1935_v55 = vpack.c.bf16 %v1911_v54, %v1862_v52 }
 0x33c   : > { %1953 = vst.msk [vmem:[%s3262_s27 + $0x50] sm:$0xff] %vm3258_vm15, %v1935_v55 }
 0x33f   : > { %v1863_v56 = vpop.f32.mrf.mxu3  ;;  %v1912_v57 = vpop.f32.mrf.mxu2 }
 0x340   : > { %v1864_v58 = vadd.f32 %v1863_v56, %v3250_v62  ;;  %v1913_v59 = vadd.f32 %v1912_v57, %v3252_v63 }
 0x342   : > { %v1936_v60 = vpack.c.bf16 %v1913_v59, %v1864_v58 }
 0x344   : > { %1954 = vst.msk [vmem:[%s3262_s27 + $0x58] sm:$0xff] %vm3258_vm15, %v1936_v60 }
 0x347   : > { %v1866_v61 = vpop.f32.mrf.mxu3  ;;  %v1915_v0 = vpop.f32.mrf.mxu2 }
 0x348   : > { %v1867_v1 = vadd.f32 %v1866_v61, %v3250_v62  ;;  %v1916_v2 = vadd.f32 %v1915_v0, %v3252_v63 }
 0x34a   : > { %v1937_v3 = vpack.c.bf16 %v1916_v2, %v1867_v1 }
 0x34c   : > { %1955 = vst.msk [vmem:[%s3262_s27 + $0x60] sm:$0xff] %vm3258_vm15, %v1937_v3 }
 0x34f   : > { %v1868_v5 = vpop.f32.mrf.mxu3  ;;  %v1917_v7 = vpop.f32.mrf.mxu2 }
 0x350   : > { %v1869_v6 = vadd.f32 %v1868_v5, %v3250_v62  ;;  %v1918_v8 = vadd.f32 %v1917_v7, %v3252_v63 }
 0x352   : > { %v1938_v9 = vpack.c.bf16 %v1918_v8, %v1869_v6 }
 0x354   : > { %1956 = vst.msk [vmem:[%s3262_s27 + $0x68] sm:$0xff] %vm3258_vm15, %v1938_v9 }
 0x357   : > { %v1871_v10 = vpop.f32.mrf.mxu3  ;;  %v1920_v11 = vpop.f32.mrf.mxu2 }
 0x358   : > { %v1872_v12 = vadd.f32 %v1871_v10, %v3250_v62  ;;  %v1921_v13 = vadd.f32 %v1920_v11, %v3252_v63 }
 0x35a   : > { %v1939_v14 = vpack.c.bf16 %v1921_v13, %v1872_v12 }
 0x35c   : > { %1957 = vst.msk [vmem:[%s3262_s27 + $0x70] sm:$0xff] %vm3258_vm15, %v1939_v14 }
 0x35f   : > { %v1873_v15 = vpop.f32.mrf.mxu3  ;;  %v1922_v16 = vpop.f32.mrf.mxu2 }
 0x360   : > { %v1874_v17 = vadd.f32 %v1873_v15, %v3250_v62  ;;  %v1923_v44 = vadd.f32 %v1922_v16, %v3252_v63  ;;  %1966 = sbr.rel (!%p2716_p9) target bundleno = 900 (0x384), region = 64 }
 0x362   : > { %v1940_v18 = vpack.c.bf16 %v1923_v44, %v1874_v17 }
 0x364   : > { %1958 = vst.msk [vmem:[%s3262_s27 + $0x78] sm:$0xff] %vm3258_vm15, %v1940_v18 }
 0x365   : > { %s3481_s24 = smov (!%p1969_p6, %s1968_s24), 16 }
 0x366   : > { %s2254_s26 = sshll.u32 %s3481_s24, 3 }
 0x367   : > { %s1973_s15 = ssub.s32 128, %s2254_s26 }
 0x368   : > { %s1974_s25 = sshll.u32 %s1973_s15, 4 }
 0x369   : > { %1975 = vsyncadd %s1960_s28, %s1974_s25  ;;  %p3351_p11 = scmp.ne.s32.totalorder %s2254_s26, 0  ;;  %s2256_s29 = sshll.u32 %s2693_s13, 7 }
 0x36a   : > { %s1979_s23 = scalar_lea.hbm %s3414_s9, %s2256_s29  ;;  %s1981_s11 = sshll.u32 %s3262_s27, 4  ;;  %s3360_s11 = int_to_ptr.vmem [resolvable:$true] %s1981_s11 }
 0x36b   : > { %s1983_s19 = sshll.u32 %s1979_s23, 4  ;;  %s2232_s18 = sshll.u32 %s3481_s24, 7  ;;  %s3362_s19 = int_to_ptr.hbm [resolvable:$true] %s1983_s19 }
 0x36c   : > { %s2537_s17 = sshra.s32 %s3360_s11, 4  ;;  %s2539_s14 = sshrl.u32 %s2232_s18, 4  ;;  %s2538_s17 = int_to_ptr.vmem [resolvable:$true] %s2537_s17 }
 0x36d   : > { %s2544_s26 = scalar_lea.vmem %s2538_s17, %s2539_s14  ;;  %s2619_s13 = smov [#allocation5]  }
 0x36e   : > { %p2545_p9 = scmp.ne.s32.totalorder %s2538_s17, %s2544_s26  ;;  %s2548_s15 = scalar_lea.vmem %s2619_s13, 256 }
 0x36f   : > { %p2550_p7 = scmp.lt.s32.totalorder %s2548_s15, %s2544_s26 }
 0x370   : > { %p2546_p13 = pnand %p2545_p9, %p3351_p11 }
 0x372   : > { %p2547_p5 = pneg %p2546_p13 }
 0x374   : > { %p2552_p8 = pnand %p2550_p7, %p2547_p5 }
 0x376   : > { %2555 = shalt.err (!%p2552_p8)
}
 0x377   : > { %s2556_s27 = sshra.s32 %s3362_s19, 4  ;;  %s2567_s16 = scalar_lea.hbm %s3414_s9, 200  ;;  %s2557_s27 = int_to_ptr.hbm [resolvable:$true] %s2556_s27 }
 0x378   : > { %s2563_s25 = scalar_lea.hbm %s2557_s27, %s2539_s14  ;;  %p2568_p2 = scmp.lt.s32.totalorder %s2557_s27, %s3414_s9 }
 0x379   : > { %p2564_p12 = scmp.ne.s32.totalorder %s2557_s27, %s2563_s25  ;;  %p2569_p3 = scmp.lt.s32.totalorder %s2567_s16, %s2563_s25 }
 0x37b   : > { %p2565_p0 = pnand %p2564_p12, %p3351_p11  ;;  %p2570_p4 = por %p2569_p3, %p2568_p2 }
 0x37d   : > { %p2566_p1 = pneg %p2565_p0 }
 0x37f   : > { %p2571_p6 = pnand %p2570_p4, %p2566_p1 }
 0x381   : > { %2574 = shalt.err (!%p2571_p6)
}
 0x382   : > { %s2620_s26 = smov 128   ;;  %s2621_s14 = smov 8  }
 0x383   : > { %1989 = dma.vmem_to_hbm [thread:$0]  (%p3351_p11), %s3360_s11, %s2232_s18, %s3362_s19, %s1960_s28, %s2620_s26, %s2620_s26, %s2621_s14  }
 0x384 PF: > { %s1998_s15 = sand.u32 1, %s2602_s30   ;;  %p3472_p9 = scmp.ge.s32.totalorder %s2614_s12, 2 }
 0x385   : > { %s1999_s27 = scalar_lea.sflag [#allocation4], %s1998_s15 }
 0x386   : > { %p2263_p13 = pnand %p3472_p9, %p2720_p10 }
 0x388   : > { %p2264_p5 = pneg %p2263_p13 }
 0x38a   : > { %2597 = dma.done.wait (%p2264_p5), %s1999_s27, 2048  }
 0x38b   : > { %2599 = vsyncadd (%p2264_p5), %s1999_s27, 4294965248  ;;  %s3473_s12 = sld [smem:[#allocation9_spill]]  ;;  %s3476_s30 = smov %s2606_s10 }
 0x38c   : > { %s3474_s25 = sld [smem:[#allocation8_spill]] }
 0x38d   : > { %s3475_s11 = sld [smem:[#allocation10_spill]] }
 0x391   : > { %p22_p7 = scmp.ge.s32.totalorder %s3473_s12, 4  }
 0x392   : > { %s3477_s10 = smov %s3474_s25 }
 0x393   :  { %24 = sbr.rel (!%p22_p7) target bundleno = 5 (0x5), region = 101 }
 0x398   :  { %2005 = vsyncpa [#allocation3], 1 }
 0x399   :  { %2007 = vsyncpa [#allocation3 + $0x1], 1 }
 0x39a   :  { %2008 = vsyncpa [#allocation4], 1 }
 0x39b   :  { %2010 = vsyncpa [#allocation4 + $0x1], 1 }

</bundles_post_ra>
